<compile_context>
chip_gen: v7x
topology: tpu7x:2x2x1
jax: 0.10.0
libtpu: 0.0.40
codegen_flags: <defaults>
</compile_context>

<pallas_src>
import math

import jax
import jax.numpy as jnp
from jax.experimental import pallas as pl
from jax.experimental.pallas import tpu as pltpu

# ----------------------------- small, self-consistent shapes -----------------------------
B = 2          # batch
S = 8          # sequence / token length
D = 32         # transformer d_model
H = 4          # attention heads
DH = D // H    # per-head dim
DFF = 64       # transformer FFN hidden dim
CY = 4         # channels of y_inputs (u0)
CY_PAD = 8     # u0 channels zero-padded to a sublane-aligned contraction dim
C = CY + D     # channels after torch.cat((u0, xf), 1)
DK = 16        # ms_loss attention key dim
DP = 16        # second dim of P
COUT = 4       # ms_loss output channels

LN_EPS = 1e-5

# weight-slab row offsets (all multiples of 8 -> clean (8,128) sublane alignment, f32 slab)
R_WQKV = 0      # (D, 3D)      rows   0..32 , cols 0..96
R_WO = 32       # (D, D)       rows  32..64 , cols 0..32
R_W1 = 64       # (D, DFF)     rows  64..96 , cols 0..64
R_W2 = 96       # (DFF, D)     rows  96..160, cols 0..32
R_NQKU = 160    # (CY_PAD,2DK) rows 160..168, cols 0..32  (rows 164..168 zero padding)
R_NQKX = 168    # (D, 2DK)     rows 168..200, cols 0..32
R_PWO = 200     # (S, COUT)    rows 200..208, cols 0..4   (P @ Wo folded in the wrapper)
W_ROWS = 208


# ----------------------------------- in-kernel helpers -----------------------------------
def _softmax_lastdim(s):
    m = jnp.max(s, axis=-1, keepdims=True)
    e = jnp.exp(s - m)
    # divide moved off the VALU onto the (otherwise idle) EUP slot
    return e * pl.reciprocal(jnp.sum(e, axis=-1, keepdims=True), approx=True)


def _layernorm(h, g, b):
    mu = jnp.mean(h, axis=-1, keepdims=True)
    var = jnp.mean((h - mu) ** 2, axis=-1, keepdims=True)
    return (h - mu) * jax.lax.rsqrt(var + LN_EPS) * g + b


# ------------------------------------ fused kernel ---------------------------------------
def fused_kernel(x_ref, u0_ref, vec_ref, w_ref, o_ref):
    f32, bf16 = jnp.float32, jnp.bfloat16

    # ---------------- transformer encoder layer (post-LN), batched over B*S rows ----------
    x2 = x_ref[...]                                                            # (B*S, D) f32

    # QKV: one stacked (D, 3D) MXU push, bf16 operands, f32 accumulation
    qkv = jnp.dot(x2.astype(bf16), w_ref[R_WQKV:R_WQKV + D, 0:3 * D].astype(bf16),
                  preferred_element_type=f32) + vec_ref[0:1, 0:3 * D]
    q = qkv[:, 0 * D:1 * D].reshape(B, S, D)
    k = qkv[:, 1 * D:2 * D].reshape(B, S, D)
    v = qkv[:, 2 * D:3 * D].reshape(B, S, D)

    scale = 1.0 / math.sqrt(DH)
    heads = []
    for h in range(H):                                   # static H=4 loop, tiny 3-D einsums
        sl = slice(h * DH, (h + 1) * DH)
        s = jnp.einsum("bqd,bkd->bqk", q[..., sl].astype(bf16), k[..., sl].astype(bf16),
                       preferred_element_type=f32) * scale                    # (B, S, S)
        p = _softmax_lastdim(s)
        heads.append(jnp.einsum("bqk,bkd->bqd", p.astype(bf16), v[..., sl].astype(bf16),
                                preferred_element_type=f32))                  # (B, S, DH)
    # lane-concat of head outputs + ONE Wo dot (replaces 4 per-head Wo pushes + adds)
    attn = jnp.concatenate(heads, axis=-1).reshape(B * S, D)
    attn = jnp.dot(attn.astype(bf16), w_ref[R_WO:R_WO + D, 0:D].astype(bf16),
                   preferred_element_type=f32) + vec_ref[1:2, 0:D]

    h1n = _layernorm(x2 + attn, vec_ref[2:3, 0:D], vec_ref[3:4, 0:D])

    ff = jnp.dot(h1n.astype(bf16), w_ref[R_W1:R_W1 + D, 0:DFF].astype(bf16),
                 preferred_element_type=f32) + vec_ref[4:5, 0:DFF]
    ff = jnp.maximum(ff, 0.0)
    ff = jnp.dot(ff.astype(bf16), w_ref[R_W2:R_W2 + DFF, 0:D].astype(bf16),
                 preferred_element_type=f32) + vec_ref[5:6, 0:D]

    xf = _layernorm(h1n + ff, vec_ref[6:7, 0:D], vec_ref[7:8, 0:D])           # (B*S, D)

    # ---------------- NAO / ms_loss; concat(u0, xf^T) folded into the projections ----------
    #   z @ [Wq|Wk] == u0^T @ [Wq|Wk][:CY, :] + xf @ [Wq|Wk][CY:, :]   (merged q/k weights)
    # TODO(synk): PyTorch casts to double here; TPU Pallas has no float64 — computed in f32.
    u0 = u0_ref[...]                                                           # (B*S, CY_PAD)
    qkn = (jnp.dot(u0.astype(bf16), w_ref[R_NQKU:R_NQKU + CY_PAD, 0:2 * DK].astype(bf16),
                   preferred_element_type=f32) +
           jnp.dot(xf.astype(bf16), w_ref[R_NQKX:R_NQKX + D, 0:2 * DK].astype(bf16),
                   preferred_element_type=f32))                                # (B*S, 2*DK)
    qn = qkn[:, 0:DK].reshape(B, S, DK)
    kn = qkn[:, DK:2 * DK].reshape(B, S, DK)

    sn = jnp.einsum("bqd,bkd->bqk", qn.astype(bf16), kn.astype(bf16),
                    preferred_element_type=f32) * (1.0 / math.sqrt(DK))        # (B, S, S)
    an = _softmax_lastdim(sn).reshape(B * S, S)

    # P @ Wo pre-folded in the wrapper -> single final (B*S,S)@(S,COUT) push, flat 2-D store
    o_ref[...] = jnp.dot(an.astype(bf16), w_ref[R_PWO:R_PWO + S, 0:COUT].astype(bf16),
                         preferred_element_type=f32)                           # (B*S, COUT)


# --------------------------------- wrapper-side packing ----------------------------------
def _pack_params(params):
    """Pack every bias/LN vector into one (8,128) slab and every weight matrix into one
    (208,128) slab (2 DMAs instead of ~18).  Tiny; fused/folded under jit."""
    tp, mp = params["transformer"], params["ms_loss"]

    vec = jnp.zeros((8, 128), jnp.float32)
    rows = [jnp.concatenate([tp["bq"], tp["bk"], tp["bv"]], axis=1),   # 0: bqkv (1,96)
            tp["bo"],                                                  # 1
            tp["ln1_g"], tp["ln1_b"],                                  # 2, 3
            tp["b1"], tp["b2"],                                        # 4, 5
            tp["ln2_g"], tp["ln2_b"]]                                  # 6, 7
    for i, r in enumerate(rows):
        vec = vec.at[i:i + 1, :r.shape[1]].set(r.astype(jnp.float32))

    wqkv = jnp.concatenate([tp["wq"], tp["wk"], tp["wv"]], axis=1)     # (D, 3D)
    nqk_u = jnp.concatenate([mp["wq"][:CY], mp["wk"][:CY]], axis=1)    # (CY, 2DK)
    nqk_x = jnp.concatenate([mp["wq"][CY:], mp["wk"][CY:]], axis=1)    # (D, 2DK)
    pwo = mp["P"] @ mp["wo"]                                           # (S, COUT)

    w = jnp.zeros((W_ROWS, 128), jnp.float32)
    for mat, r0 in [(wqkv, R_WQKV), (tp["wo"], R_WO), (tp["w1"], R_W1), (tp["w2"], R_W2),
                    (nqk_u, R_NQKU), (nqk_x, R_NQKX), (pwo, R_PWO)]:
        r, c = mat.shape
        w = w.at[r0:r0 + r, :c].set(mat.astype(jnp.float32))
    return vec, w


# -------------------------------- CombinedModel.forward ----------------------------------
@jax.jit
def combined_model_forward(inputs, y_inputs, params):
    vec, w = _pack_params(params)

    # u0 = y_inputs.permute(0,1,2) is identity; only its transpose feeds the fused kernel.
    # All reshapes done here so the kernel sees flat, lane-friendly 2-D operands.
    x2 = inputs.astype(jnp.float32).reshape(B * S, D)
    u0 = jnp.transpose(y_inputs, (0, 2, 1)).astype(jnp.float32).reshape(B * S, CY)
    u0 = jnp.pad(u0, ((0, 0), (0, CY_PAD - CY)))                       # zero-pad contraction dim

    out2d = pl.pallas_call(
        fused_kernel,
        out_shape=jax.ShapeDtypeStruct((B * S, COUT), jnp.float32),
        in_specs=[pl.BlockSpec(memory_space=pltpu.MemorySpace.VMEM)] * 4,
        out_specs=pl.BlockSpec(memory_space=pltpu.MemorySpace.VMEM),
    )(x2, u0, vec, w)
    # TODO(synk): if B/S scale up, add a grid over B with dimension_semantics=("parallel",)
    # (v7x dual-TC) and re-check the whole-in-VMEM assumption against 64 MiB.
    return out2d.reshape(B, S, COUT)                                   # [B, S, COUT]


# ------------------------------------ reference (plain JAX, f32) -------------------------
def reference_forward(inputs, y_inputs, params):
    tp, mp = params["transformer"], params["ms_loss"]
    x = inputs
    q = x @ tp["wq"] + tp["bq"]
    k = x @ tp["wk"] + tp["bk"]
    v = x @ tp["wv"] + tp["bv"]
    heads = []
    for h in range(H):
        sl = slice(h * DH, (h + 1) * DH)
        s = jnp.einsum("bqd,bkd->bqk", q[..., sl], k[..., sl]) / math.sqrt(DH)
        heads.append(jnp.einsum("bqk,bkd->bqd", jax.nn.softmax(s, -1), v[..., sl]))
    attn = jnp.concatenate(heads, -1) @ tp["wo"] + tp["bo"]
    h1 = x + attn
    h1n = (h1 - h1.mean(-1, keepdims=True)) * jax.lax.rsqrt(h1.var(-1, keepdims=True) + LN_EPS)
    h1n = h1n * tp["ln1_g"] + tp["ln1_b"]
    ff = jnp.maximum(h1n @ tp["w1"] + tp["b1"], 0.0) @ tp["w2"] + tp["b2"]
    h2 = h1n + ff
    h2n = (h2 - h2.mean(-1, keepdims=True)) * jax.lax.rsqrt(h2.var(-1, keepdims=True) + LN_EPS)
    xf = h2n * tp["ln2_g"] + tp["ln2_b"]
    cat = jnp.concatenate([y_inputs, jnp.transpose(xf, (0, 2, 1))], axis=1)
    z = jnp.transpose(cat, (0, 2, 1))
    qz = z @ mp["wq"]
    kz = z @ mp["wk"]
    a = jax.nn.softmax(jnp.einsum("bqd,bkd->bqk", qz, kz) / math.sqrt(DK), -1)
    return (a @ mp["P"]) @ mp["wo"]


# -------------------------------------- params & main -------------------------------------
def init_params(key):
    ks = jax.random.split(key, 16)

    def lin(k, fan_in, shape):
        return (jax.random.normal(k, shape, jnp.float32) / math.sqrt(fan_in)).astype(jnp.float32)

    transformer = dict(
        wq=lin(ks[0], D, (D, D)), bq=jnp.zeros((1, D), jnp.float32),
        wk=lin(ks[1], D, (D, D)), bk=jnp.zeros((1, D), jnp.float32),
        wv=lin(ks[2], D, (D, D)), bv=jnp.zeros((1, D), jnp.float32),
        wo=lin(ks[3], D, (D, D)), bo=jnp.zeros((1, D), jnp.float32),
        ln1_g=jnp.ones((1, D), jnp.float32), ln1_b=jnp.zeros((1, D), jnp.float32),
        w1=lin(ks[4], D, (D, DFF)), b1=jnp.zeros((1, DFF), jnp.float32),
        w2=lin(ks[5], DFF, (DFF, D)), b2=jnp.zeros((1, D), jnp.float32),
        ln2_g=jnp.ones((1, D), jnp.float32), ln2_b=jnp.zeros((1, D), jnp.float32),
    )
    ms_loss = dict(
        wq=lin(ks[6], C, (C, DK)),
        wk=lin(ks[7], C, (C, DK)),
        P=lin(ks[8], S, (S, DP)),      # the fixed operator matrix P of CombinedModel
        wo=lin(ks[9], DP, (DP, COUT)),
    )
    return dict(transformer=transformer, ms_loss=ms_loss)


if __name__ == "__main__":
    key = jax.random.PRNGKey(0)
    k_in, k_y, k_p = jax.random.split(key, 3)

    inputs = jax.random.normal(k_in, (B, S, D), jnp.float32)     # [B, S, D]
    y_inputs = jax.random.normal(k_y, (B, CY, S), jnp.float32)   # [B, CY, S]
    params = init_params(k_p)

    out = combined_model_forward(inputs, y_inputs, params)
    out = jax.block_until_ready(out)

    ref = reference_forward(inputs, y_inputs, params)
    assert out.shape == (B, S, COUT), out.shape
    assert bool(jnp.all(jnp.isfinite(out)))
    # bf16 MXU operands (f32 accumulation) + approx reciprocal -> compare against the exact f32
    # reference with a correspondingly wider tolerance.
    err = float(jnp.max(jnp.abs(out - ref)))
    assert bool(jnp.allclose(out, ref, rtol=5e-2, atol=5e-2)), err

    print("KERNEL_OK")
</pallas_src>

<mosaic_0001>
module attributes {stable_mosaic.version = 11 : i64} {
  func.func @fused_kernel(%arg0: memref<16x32xf32, #tpu.memory_space<vmem>>, %arg1: memref<16x8xf32, #tpu.memory_space<vmem>>, %arg2: memref<8x128xf32, #tpu.memory_space<vmem>>, %arg3: memref<208x128xf32, #tpu.memory_space<vmem>>, %arg4: memref<16x4xf32, #tpu.memory_space<vmem>>) attributes {dimension_semantics = [], scalar_prefetch = 0 : i64, scratch_operands = 0 : i64, tpu.core_type = #tpu.core_type<tc>} {
    %c0 = arith.constant 0 : index
    %c0_0 = arith.constant 0 : index
    %0 = vector.load %arg0[%c0, %c0_0] : memref<16x32xf32, #tpu.memory_space<vmem>>, vector<16x32xf32>
    %1 = arith.truncf %0 : vector<16x32xf32> to vector<16x32xbf16>
    %c0_1 = arith.constant 0 : index
    %c0_2 = arith.constant 0 : index
    %2 = vector.load %arg3[%c0_1, %c0_2] : memref<208x128xf32, #tpu.memory_space<vmem>>, vector<32x96xf32>
    %3 = arith.truncf %2 : vector<32x96xf32> to vector<32x96xbf16>
    %cst = arith.constant dense<0.000000e+00> : vector<16x96xf32>
    %4 = tpu.matmul %1, %3, %cst {dimension_numbers = #tpu.dot_dimension_numbers<[1], [0], [0], [1], [0, 0, 1, 1], [], []>} : vector<16x32xbf16>, vector<32x96xbf16>, vector<16x96xf32> -> vector<16x96xf32>
    %c0_3 = arith.constant 0 : index
    %c0_4 = arith.constant 0 : index
    %5 = vector.load %arg2[%c0_3, %c0_4] : memref<8x128xf32, #tpu.memory_space<vmem>>, vector<1x96xf32>
    %6 = vector.broadcast %5 : vector<1x96xf32> to vector<16x96xf32>
    %7 = arith.addf %4, %6 : vector<16x96xf32>
    %8 = vector.extract_strided_slice %7 {offsets = [0, 0], sizes = [16, 32], strides = [1, 1]} : vector<16x96xf32> to vector<16x32xf32>
    %9 = vector.shape_cast %8 : vector<16x32xf32> to vector<2x8x32xf32>
    %10 = vector.extract_strided_slice %7 {offsets = [0, 32], sizes = [16, 32], strides = [1, 1]} : vector<16x96xf32> to vector<16x32xf32>
    %11 = vector.shape_cast %10 : vector<16x32xf32> to vector<2x8x32xf32>
    %12 = vector.extract_strided_slice %7 {offsets = [0, 64], sizes = [16, 32], strides = [1, 1]} : vector<16x96xf32> to vector<16x32xf32>
    %13 = vector.shape_cast %12 : vector<16x32xf32> to vector<2x8x32xf32>
    %14 = vector.extract_strided_slice %9 {offsets = [0, 0, 0], sizes = [2, 8, 8], strides = [1, 1, 1]} : vector<2x8x32xf32> to vector<2x8x8xf32>
    %15 = arith.truncf %14 : vector<2x8x8xf32> to vector<2x8x8xbf16>
    %16 = vector.extract_strided_slice %11 {offsets = [0, 0, 0], sizes = [2, 8, 8], strides = [1, 1, 1]} : vector<2x8x32xf32> to vector<2x8x8xf32>
    %17 = arith.truncf %16 : vector<2x8x8xf32> to vector<2x8x8xbf16>
    "tpu.trace_start"() <{level = 10 : i32, message = "bqd,bkd->bqk"}> : () -> ()
    %cst_5 = arith.constant dense<0.000000e+00> : vector<2x8x8xf32>
    %18 = tpu.matmul %15, %17, %cst_5 {dimension_numbers = #tpu.dot_dimension_numbers<[2], [2], [1], [1], [0, 0, 0, 1, 1, 1], [0], [0]>} : vector<2x8x8xbf16>, vector<2x8x8xbf16>, vector<2x8x8xf32> -> vector<2x8x8xf32>
    "tpu.trace_stop"() : () -> ()
    %cst_6 = arith.constant 0.353553385 : f32
    %19 = vector.broadcast %cst_6 : f32 to vector<2x8x8xf32>
    %20 = arith.mulf %18, %19 : vector<2x8x8xf32>
    %cst_7 = arith.constant dense<0xFF800000> : vector<2x8xf32>
    %21 = vector.multi_reduction <maximumf>, %20, %cst_7 [2] : vector<2x8x8xf32> to vector<2x8xf32>
    %22 = vector.shape_cast %21 : vector<2x8xf32> to vector<2x8x1xf32>
    %23 = vector.broadcast %22 : vector<2x8x1xf32> to vector<2x8x8xf32>
    %24 = arith.subf %20, %23 : vector<2x8x8xf32>
    %25 = math.exp %24 : vector<2x8x8xf32>
    %cst_8 = arith.constant dense<0.000000e+00> : vector<2x8xf32>
    %26 = vector.multi_reduction <add>, %25, %cst_8 [2] : vector<2x8x8xf32> to vector<2x8xf32>
    %27 = vector.shape_cast %26 : vector<2x8xf32> to vector<2x8x1xf32>
    %28 = tpu.reciprocal %27 {approx = true} : vector<2x8x1xf32> -> vector<2x8x1xf32>
    %29 = vector.broadcast %28 : vector<2x8x1xf32> to vector<2x8x8xf32>
    %30 = arith.mulf %25, %29 : vector<2x8x8xf32>
    %31 = arith.truncf %30 : vector<2x8x8xf32> to vector<2x8x8xbf16>
    %32 = vector.extract_strided_slice %13 {offsets = [0, 0, 0], sizes = [2, 8, 8], strides = [1, 1, 1]} : vector<2x8x32xf32> to vector<2x8x8xf32>
    %33 = arith.truncf %32 : vector<2x8x8xf32> to vector<2x8x8xbf16>
    "tpu.trace_start"() <{level = 10 : i32, message = "bqk,bkd->bqd"}> : () -> ()
    %cst_9 = arith.constant dense<0.000000e+00> : vector<2x8x8xf32>
    %34 = tpu.matmul %31, %33, %cst_9 {dimension_numbers = #tpu.dot_dimension_numbers<[2], [1], [1], [2], [0, 0, 0, 1, 1, 2], [0], [0]>} : vector<2x8x8xbf16>, vector<2x8x8xbf16>, vector<2x8x8xf32> -> vector<2x8x8xf32>
    "tpu.trace_stop"() : () -> ()
    %35 = vector.extract_strided_slice %9 {offsets = [0, 0, 8], sizes = [2, 8, 8], strides = [1, 1, 1]} : vector<2x8x32xf32> to vector<2x8x8xf32>
    %36 = arith.truncf %35 : vector<2x8x8xf32> to vector<2x8x8xbf16>
    %37 = vector.extract_strided_slice %11 {offsets = [0, 0, 8], sizes = [2, 8, 8], strides = [1, 1, 1]} : vector<2x8x32xf32> to vector<2x8x8xf32>
    %38 = arith.truncf %37 : vector<2x8x8xf32> to vector<2x8x8xbf16>
    "tpu.trace_start"() <{level = 10 : i32, message = "bqd,bkd->bqk"}> : () -> ()
    %cst_10 = arith.constant dense<0.000000e+00> : vector<2x8x8xf32>
    %39 = tpu.matmul %36, %38, %cst_10 {dimension_numbers = #tpu.dot_dimension_numbers<[2], [2], [1], [1], [0, 0, 0, 1, 1, 1], [0], [0]>} : vector<2x8x8xbf16>, vector<2x8x8xbf16>, vector<2x8x8xf32> -> vector<2x8x8xf32>
    "tpu.trace_stop"() : () -> ()
    %cst_11 = arith.constant 0.353553385 : f32
    %40 = vector.broadcast %cst_11 : f32 to vector<2x8x8xf32>
    %41 = arith.mulf %39, %40 : vector<2x8x8xf32>
    %cst_12 = arith.constant dense<0xFF800000> : vector<2x8xf32>
    %42 = vector.multi_reduction <maximumf>, %41, %cst_12 [2] : vector<2x8x8xf32> to vector<2x8xf32>
    %43 = vector.shape_cast %42 : vector<2x8xf32> to vector<2x8x1xf32>
    %44 = vector.broadcast %43 : vector<2x8x1xf32> to vector<2x8x8xf32>
    %45 = arith.subf %41, %44 : vector<2x8x8xf32>
    %46 = math.exp %45 : vector<2x8x8xf32>
    %cst_13 = arith.constant dense<0.000000e+00> : vector<2x8xf32>
    %47 = vector.multi_reduction <add>, %46, %cst_13 [2] : vector<2x8x8xf32> to vector<2x8xf32>
    %48 = vector.shape_cast %47 : vector<2x8xf32> to vector<2x8x1xf32>
    %49 = tpu.reciprocal %48 {approx = true} : vector<2x8x1xf32> -> vector<2x8x1xf32>
    %50 = vector.broadcast %49 : vector<2x8x1xf32> to vector<2x8x8xf32>
    %51 = arith.mulf %46, %50 : vector<2x8x8xf32>
    %52 = arith.truncf %51 : vector<2x8x8xf32> to vector<2x8x8xbf16>
    %53 = vector.extract_strided_slice %13 {offsets = [0, 0, 8], sizes = [2, 8, 8], strides = [1, 1, 1]} : vector<2x8x32xf32> to vector<2x8x8xf32>
    %54 = arith.truncf %53 : vector<2x8x8xf32> to vector<2x8x8xbf16>
    "tpu.trace_start"() <{level = 10 : i32, message = "bqk,bkd->bqd"}> : () -> ()
    %cst_14 = arith.constant dense<0.000000e+00> : vector<2x8x8xf32>
    %55 = tpu.matmul %52, %54, %cst_14 {dimension_numbers = #tpu.dot_dimension_numbers<[2], [1], [1], [2], [0, 0, 0, 1, 1, 2], [0], [0]>} : vector<2x8x8xbf16>, vector<2x8x8xbf16>, vector<2x8x8xf32> -> vector<2x8x8xf32>
    "tpu.trace_stop"() : () -> ()
    %56 = vector.extract_strided_slice %9 {offsets = [0, 0, 16], sizes = [2, 8, 8], strides = [1, 1, 1]} : vector<2x8x32xf32> to vector<2x8x8xf32>
    %57 = arith.truncf %56 : vector<2x8x8xf32> to vector<2x8x8xbf16>
    %58 = vector.extract_strided_slice %11 {offsets = [0, 0, 16], sizes = [2, 8, 8], strides = [1, 1, 1]} : vector<2x8x32xf32> to vector<2x8x8xf32>
    %59 = arith.truncf %58 : vector<2x8x8xf32> to vector<2x8x8xbf16>
    "tpu.trace_start"() <{level = 10 : i32, message = "bqd,bkd->bqk"}> : () -> ()
    %cst_15 = arith.constant dense<0.000000e+00> : vector<2x8x8xf32>
    %60 = tpu.matmul %57, %59, %cst_15 {dimension_numbers = #tpu.dot_dimension_numbers<[2], [2], [1], [1], [0, 0, 0, 1, 1, 1], [0], [0]>} : vector<2x8x8xbf16>, vector<2x8x8xbf16>, vector<2x8x8xf32> -> vector<2x8x8xf32>
    "tpu.trace_stop"() : () -> ()
    %cst_16 = arith.constant 0.353553385 : f32
    %61 = vector.broadcast %cst_16 : f32 to vector<2x8x8xf32>
    %62 = arith.mulf %60, %61 : vector<2x8x8xf32>
    %cst_17 = arith.constant dense<0xFF800000> : vector<2x8xf32>
    %63 = vector.multi_reduction <maximumf>, %62, %cst_17 [2] : vector<2x8x8xf32> to vector<2x8xf32>
    %64 = vector.shape_cast %63 : vector<2x8xf32> to vector<2x8x1xf32>
    %65 = vector.broadcast %64 : vector<2x8x1xf32> to vector<2x8x8xf32>
    %66 = arith.subf %62, %65 : vector<2x8x8xf32>
    %67 = math.exp %66 : vector<2x8x8xf32>
    %cst_18 = arith.constant dense<0.000000e+00> : vector<2x8xf32>
    %68 = vector.multi_reduction <add>, %67, %cst_18 [2] : vector<2x8x8xf32> to vector<2x8xf32>
    %69 = vector.shape_cast %68 : vector<2x8xf32> to vector<2x8x1xf32>
    %70 = tpu.reciprocal %69 {approx = true} : vector<2x8x1xf32> -> vector<2x8x1xf32>
    %71 = vector.broadcast %70 : vector<2x8x1xf32> to vector<2x8x8xf32>
    %72 = arith.mulf %67, %71 : vector<2x8x8xf32>
    %73 = arith.truncf %72 : vector<2x8x8xf32> to vector<2x8x8xbf16>
    %74 = vector.extract_strided_slice %13 {offsets = [0, 0, 16], sizes = [2, 8, 8], strides = [1, 1, 1]} : vector<2x8x32xf32> to vector<2x8x8xf32>
    %75 = arith.truncf %74 : vector<2x8x8xf32> to vector<2x8x8xbf16>
    "tpu.trace_start"() <{level = 10 : i32, message = "bqk,bkd->bqd"}> : () -> ()
    %cst_19 = arith.constant dense<0.000000e+00> : vector<2x8x8xf32>
    %76 = tpu.matmul %73, %75, %cst_19 {dimension_numbers = #tpu.dot_dimension_numbers<[2], [1], [1], [2], [0, 0, 0, 1, 1, 2], [0], [0]>} : vector<2x8x8xbf16>, vector<2x8x8xbf16>, vector<2x8x8xf32> -> vector<2x8x8xf32>
    "tpu.trace_stop"() : () -> ()
    %77 = vector.extract_strided_slice %9 {offsets = [0, 0, 24], sizes = [2, 8, 8], strides = [1, 1, 1]} : vector<2x8x32xf32> to vector<2x8x8xf32>
    %78 = arith.truncf %77 : vector<2x8x8xf32> to vector<2x8x8xbf16>
    %79 = vector.extract_strided_slice %11 {offsets = [0, 0, 24], sizes = [2, 8, 8], strides = [1, 1, 1]} : vector<2x8x32xf32> to vector<2x8x8xf32>
    %80 = arith.truncf %79 : vector<2x8x8xf32> to vector<2x8x8xbf16>
    "tpu.trace_start"() <{level = 10 : i32, message = "bqd,bkd->bqk"}> : () -> ()
    %cst_20 = arith.constant dense<0.000000e+00> : vector<2x8x8xf32>
    %81 = tpu.matmul %78, %80, %cst_20 {dimension_numbers = #tpu.dot_dimension_numbers<[2], [2], [1], [1], [0, 0, 0, 1, 1, 1], [0], [0]>} : vector<2x8x8xbf16>, vector<2x8x8xbf16>, vector<2x8x8xf32> -> vector<2x8x8xf32>
    "tpu.trace_stop"() : () -> ()
    %cst_21 = arith.constant 0.353553385 : f32
    %82 = vector.broadcast %cst_21 : f32 to vector<2x8x8xf32>
    %83 = arith.mulf %81, %82 : vector<2x8x8xf32>
    %cst_22 = arith.constant dense<0xFF800000> : vector<2x8xf32>
    %84 = vector.multi_reduction <maximumf>, %83, %cst_22 [2] : vector<2x8x8xf32> to vector<2x8xf32>
    %85 = vector.shape_cast %84 : vector<2x8xf32> to vector<2x8x1xf32>
    %86 = vector.broadcast %85 : vector<2x8x1xf32> to vector<2x8x8xf32>
    %87 = arith.subf %83, %86 : vector<2x8x8xf32>
    %88 = math.exp %87 : vector<2x8x8xf32>
    %cst_23 = arith.constant dense<0.000000e+00> : vector<2x8xf32>
    %89 = vector.multi_reduction <add>, %88, %cst_23 [2] : vector<2x8x8xf32> to vector<2x8xf32>
    %90 = vector.shape_cast %89 : vector<2x8xf32> to vector<2x8x1xf32>
    %91 = tpu.reciprocal %90 {approx = true} : vector<2x8x1xf32> -> vector<2x8x1xf32>
    %92 = vector.broadcast %91 : vector<2x8x1xf32> to vector<2x8x8xf32>
    %93 = arith.mulf %88, %92 : vector<2x8x8xf32>
    %94 = arith.truncf %93 : vector<2x8x8xf32> to vector<2x8x8xbf16>
    %95 = vector.extract_strided_slice %13 {offsets = [0, 0, 24], sizes = [2, 8, 8], strides = [1, 1, 1]} : vector<2x8x32xf32> to vector<2x8x8xf32>
    %96 = arith.truncf %95 : vector<2x8x8xf32> to vector<2x8x8xbf16>
    "tpu.trace_start"() <{level = 10 : i32, message = "bqk,bkd->bqd"}> : () -> ()
    %cst_24 = arith.constant dense<0.000000e+00> : vector<2x8x8xf32>
    %97 = tpu.matmul %94, %96, %cst_24 {dimension_numbers = #tpu.dot_dimension_numbers<[2], [1], [1], [2], [0, 0, 0, 1, 1, 2], [0], [0]>} : vector<2x8x8xbf16>, vector<2x8x8xbf16>, vector<2x8x8xf32> -> vector<2x8x8xf32>
    "tpu.trace_stop"() : () -> ()
    %98 = tpu.concatenate %34, %55, %76, %97 in 2 : vector<2x8x8xf32>, vector<2x8x8xf32>, vector<2x8x8xf32>, vector<2x8x8xf32> -> vector<2x8x32xf32>
    %99 = vector.shape_cast %98 : vector<2x8x32xf32> to vector<16x32xf32>
    %100 = arith.truncf %99 : vector<16x32xf32> to vector<16x32xbf16>
    %c32 = arith.constant 32 : index
    %c0_25 = arith.constant 0 : index
    %101 = vector.load %arg3[%c32, %c0_25] : memref<208x128xf32, #tpu.memory_space<vmem>>, vector<32x32xf32>
    %102 = arith.truncf %101 : vector<32x32xf32> to vector<32x32xbf16>
    %cst_26 = arith.constant dense<0.000000e+00> : vector<16x32xf32>
    %103 = tpu.matmul %100, %102, %cst_26 {dimension_numbers = #tpu.dot_dimension_numbers<[1], [0], [0], [1], [0, 0, 1, 1], [], []>} : vector<16x32xbf16>, vector<32x32xbf16>, vector<16x32xf32> -> vector<16x32xf32>
    %c1 = arith.constant 1 : index
    %c0_27 = arith.constant 0 : index
    %104 = vector.load %arg2[%c1, %c0_27] : memref<8x128xf32, #tpu.memory_space<vmem>>, vector<1x32xf32>
    %105 = vector.broadcast %104 : vector<1x32xf32> to vector<16x32xf32>
    %106 = arith.addf %103, %105 : vector<16x32xf32>
    %107 = arith.addf %0, %106 : vector<16x32xf32>
    %c2 = arith.constant 2 : index
    %c0_28 = arith.constant 0 : index
    %108 = vector.load %arg2[%c2, %c0_28] : memref<8x128xf32, #tpu.memory_space<vmem>>, vector<1x32xf32>
    %c3 = arith.constant 3 : index
    %c0_29 = arith.constant 0 : index
    %109 = vector.load %arg2[%c3, %c0_29] : memref<8x128xf32, #tpu.memory_space<vmem>>, vector<1x32xf32>
    %cst_30 = arith.constant dense<0.000000e+00> : vector<16xf32>
    %110 = vector.multi_reduction <add>, %107, %cst_30 [1] : vector<16x32xf32> to vector<16xf32>
    %111 = vector.shape_cast %110 : vector<16xf32> to vector<16x1xf32>
    %cst_31 = arith.constant 3.200000e+01 : f32
    %112 = vector.broadcast %cst_31 : f32 to vector<16x1xf32>
    %113 = arith.divf %111, %112 : vector<16x1xf32>
    %114 = vector.broadcast %113 : vector<16x1xf32> to vector<16x32xf32>
    %115 = arith.subf %107, %114 : vector<16x32xf32>
    %116 = arith.mulf %115, %115 : vector<16x32xf32>
    %cst_32 = arith.constant dense<0.000000e+00> : vector<16xf32>
    %117 = vector.multi_reduction <add>, %116, %cst_32 [1] : vector<16x32xf32> to vector<16xf32>
    %118 = vector.shape_cast %117 : vector<16xf32> to vector<16x1xf32>
    %cst_33 = arith.constant 3.200000e+01 : f32
    %119 = vector.broadcast %cst_33 : f32 to vector<16x1xf32>
    %120 = arith.divf %118, %119 : vector<16x1xf32>
    %121 = vector.broadcast %113 : vector<16x1xf32> to vector<16x32xf32>
    %122 = arith.subf %107, %121 : vector<16x32xf32>
    %cst_34 = arith.constant 9.99999974E-6 : f32
    %123 = vector.broadcast %cst_34 : f32 to vector<16x1xf32>
    %124 = arith.addf %120, %123 : vector<16x1xf32>
    %125 = math.rsqrt %124 : vector<16x1xf32>
    %126 = vector.broadcast %125 : vector<16x1xf32> to vector<16x32xf32>
    %127 = arith.mulf %122, %126 : vector<16x32xf32>
    %128 = vector.broadcast %108 : vector<1x32xf32> to vector<16x32xf32>
    %129 = arith.mulf %127, %128 : vector<16x32xf32>
    %130 = vector.broadcast %109 : vector<1x32xf32> to vector<16x32xf32>
    %131 = arith.addf %129, %130 : vector<16x32xf32>
    %132 = arith.truncf %131 : vector<16x32xf32> to vector<16x32xbf16>
    %c64 = arith.constant 64 : index
    %c0_35 = arith.constant 0 : index
    %133 = vector.load %arg3[%c64, %c0_35] : memref<208x128xf32, #tpu.memory_space<vmem>>, vector<32x64xf32>
    %134 = arith.truncf %133 : vector<32x64xf32> to vector<32x64xbf16>
    %cst_36 = arith.constant dense<0.000000e+00> : vector<16x64xf32>
    %135 = tpu.matmul %132, %134, %cst_36 {dimension_numbers = #tpu.dot_dimension_numbers<[1], [0], [0], [1], [0, 0, 1, 1], [], []>} : vector<16x32xbf16>, vector<32x64xbf16>, vector<16x64xf32> -> vector<16x64xf32>
    %c4 = arith.constant 4 : index
    %c0_37 = arith.constant 0 : index
    %136 = vector.load %arg2[%c4, %c0_37] : memref<8x128xf32, #tpu.memory_space<vmem>>, vector<1x64xf32>
    %137 = vector.broadcast %136 : vector<1x64xf32> to vector<16x64xf32>
    %138 = arith.addf %135, %137 : vector<16x64xf32>
    %cst_38 = arith.constant 0.000000e+00 : f32
    %139 = vector.broadcast %cst_38 : f32 to vector<16x64xf32>
    %140 = arith.maximumf %138, %139 : vector<16x64xf32>
    %141 = arith.truncf %140 : vector<16x64xf32> to vector<16x64xbf16>
    %c96 = arith.constant 96 : index
    %c0_39 = arith.constant 0 : index
    %142 = vector.load %arg3[%c96, %c0_39] : memref<208x128xf32, #tpu.memory_space<vmem>>, vector<64x32xf32>
    %143 = arith.truncf %142 : vector<64x32xf32> to vector<64x32xbf16>
    %cst_40 = arith.constant dense<0.000000e+00> : vector<16x32xf32>
    %144 = tpu.matmul %141, %143, %cst_40 {dimension_numbers = #tpu.dot_dimension_numbers<[1], [0], [0], [1], [0, 0, 1, 1], [], []>} : vector<16x64xbf16>, vector<64x32xbf16>, vector<16x32xf32> -> vector<16x32xf32>
    %c5 = arith.constant 5 : index
    %c0_41 = arith.constant 0 : index
    %145 = vector.load %arg2[%c5, %c0_41] : memref<8x128xf32, #tpu.memory_space<vmem>>, vector<1x32xf32>
    %146 = vector.broadcast %145 : vector<1x32xf32> to vector<16x32xf32>
    %147 = arith.addf %144, %146 : vector<16x32xf32>
    %148 = arith.addf %131, %147 : vector<16x32xf32>
    %c6 = arith.constant 6 : index
    %c0_42 = arith.constant 0 : index
    %149 = vector.load %arg2[%c6, %c0_42] : memref<8x128xf32, #tpu.memory_space<vmem>>, vector<1x32xf32>
    %c7 = arith.constant 7 : index
    %c0_43 = arith.constant 0 : index
    %150 = vector.load %arg2[%c7, %c0_43] : memref<8x128xf32, #tpu.memory_space<vmem>>, vector<1x32xf32>
    %cst_44 = arith.constant dense<0.000000e+00> : vector<16xf32>
    %151 = vector.multi_reduction <add>, %148, %cst_44 [1] : vector<16x32xf32> to vector<16xf32>
    %152 = vector.shape_cast %151 : vector<16xf32> to vector<16x1xf32>
    %cst_45 = arith.constant 3.200000e+01 : f32
    %153 = vector.broadcast %cst_45 : f32 to vector<16x1xf32>
    %154 = arith.divf %152, %153 : vector<16x1xf32>
    %155 = vector.broadcast %154 : vector<16x1xf32> to vector<16x32xf32>
    %156 = arith.subf %148, %155 : vector<16x32xf32>
    %157 = arith.mulf %156, %156 : vector<16x32xf32>
    %cst_46 = arith.constant dense<0.000000e+00> : vector<16xf32>
    %158 = vector.multi_reduction <add>, %157, %cst_46 [1] : vector<16x32xf32> to vector<16xf32>
    %159 = vector.shape_cast %158 : vector<16xf32> to vector<16x1xf32>
    %cst_47 = arith.constant 3.200000e+01 : f32
    %160 = vector.broadcast %cst_47 : f32 to vector<16x1xf32>
    %161 = arith.divf %159, %160 : vector<16x1xf32>
    %162 = vector.broadcast %154 : vector<16x1xf32> to vector<16x32xf32>
    %163 = arith.subf %148, %162 : vector<16x32xf32>
    %cst_48 = arith.constant 9.99999974E-6 : f32
    %164 = vector.broadcast %cst_48 : f32 to vector<16x1xf32>
    %165 = arith.addf %161, %164 : vector<16x1xf32>
    %166 = math.rsqrt %165 : vector<16x1xf32>
    %167 = vector.broadcast %166 : vector<16x1xf32> to vector<16x32xf32>
    %168 = arith.mulf %163, %167 : vector<16x32xf32>
    %169 = vector.broadcast %149 : vector<1x32xf32> to vector<16x32xf32>
    %170 = arith.mulf %168, %169 : vector<16x32xf32>
    %171 = vector.broadcast %150 : vector<1x32xf32> to vector<16x32xf32>
    %172 = arith.addf %170, %171 : vector<16x32xf32>
    %c0_49 = arith.constant 0 : index
    %c0_50 = arith.constant 0 : index
    %173 = vector.load %arg1[%c0_49, %c0_50] : memref<16x8xf32, #tpu.memory_space<vmem>>, vector<16x8xf32>
    %174 = arith.truncf %173 : vector<16x8xf32> to vector<16x8xbf16>
    %c160 = arith.constant 160 : index
    %c0_51 = arith.constant 0 : index
    %175 = vector.load %arg3[%c160, %c0_51] : memref<208x128xf32, #tpu.memory_space<vmem>>, vector<8x32xf32>
    %176 = arith.truncf %175 : vector<8x32xf32> to vector<8x32xbf16>
    %cst_52 = arith.constant dense<0.000000e+00> : vector<16x32xf32>
    %177 = tpu.matmul %174, %176, %cst_52 {dimension_numbers = #tpu.dot_dimension_numbers<[1], [0], [0], [1], [0, 0, 1, 1], [], []>} : vector<16x8xbf16>, vector<8x32xbf16>, vector<16x32xf32> -> vector<16x32xf32>
    %178 = arith.truncf %172 : vector<16x32xf32> to vector<16x32xbf16>
    %c168 = arith.constant 168 : index
    %c0_53 = arith.constant 0 : index
    %179 = vector.load %arg3[%c168, %c0_53] : memref<208x128xf32, #tpu.memory_space<vmem>>, vector<32x32xf32>
    %180 = arith.truncf %179 : vector<32x32xf32> to vector<32x32xbf16>
    %cst_54 = arith.constant dense<0.000000e+00> : vector<16x32xf32>
    %181 = tpu.matmul %178, %180, %cst_54 {dimension_numbers = #tpu.dot_dimension_numbers<[1], [0], [0], [1], [0, 0, 1, 1], [], []>} : vector<16x32xbf16>, vector<32x32xbf16>, vector<16x32xf32> -> vector<16x32xf32>
    %182 = arith.addf %177, %181 : vector<16x32xf32>
    %183 = vector.extract_strided_slice %182 {offsets = [0, 0], sizes = [16, 16], strides = [1, 1]} : vector<16x32xf32> to vector<16x16xf32>
    %184 = vector.shape_cast %183 : vector<16x16xf32> to vector<2x8x16xf32>
    %185 = vector.extract_strided_slice %182 {offsets = [0, 16], sizes = [16, 16], strides = [1, 1]} : vector<16x32xf32> to vector<16x16xf32>
    %186 = vector.shape_cast %185 : vector<16x16xf32> to vector<2x8x16xf32>
    %187 = arith.truncf %184 : vector<2x8x16xf32> to vector<2x8x16xbf16>
    %188 = arith.truncf %186 : vector<2x8x16xf32> to vector<2x8x16xbf16>
    "tpu.trace_start"() <{level = 10 : i32, message = "bqd,bkd->bqk"}> : () -> ()
    %cst_55 = arith.constant dense<0.000000e+00> : vector<2x8x8xf32>
    %189 = tpu.matmul %187, %188, %cst_55 {dimension_numbers = #tpu.dot_dimension_numbers<[2], [2], [1], [1], [0, 0, 0, 1, 1, 1], [0], [0]>} : vector<2x8x16xbf16>, vector<2x8x16xbf16>, vector<2x8x8xf32> -> vector<2x8x8xf32>
    "tpu.trace_stop"() : () -> ()
    %cst_56 = arith.constant 2.500000e-01 : f32
    %190 = vector.broadcast %cst_56 : f32 to vector<2x8x8xf32>
    %191 = arith.mulf %189, %190 : vector<2x8x8xf32>
    %cst_57 = arith.constant dense<0xFF800000> : vector<2x8xf32>
    %192 = vector.multi_reduction <maximumf>, %191, %cst_57 [2] : vector<2x8x8xf32> to vector<2x8xf32>
    %193 = vector.shape_cast %192 : vector<2x8xf32> to vector<2x8x1xf32>
    %194 = vector.broadcast %193 : vector<2x8x1xf32> to vector<2x8x8xf32>
    %195 = arith.subf %191, %194 : vector<2x8x8xf32>
    %196 = math.exp %195 : vector<2x8x8xf32>
    %cst_58 = arith.constant dense<0.000000e+00> : vector<2x8xf32>
    %197 = vector.multi_reduction <add>, %196, %cst_58 [2] : vector<2x8x8xf32> to vector<2x8xf32>
    %198 = vector.shape_cast %197 : vector<2x8xf32> to vector<2x8x1xf32>
    %199 = tpu.reciprocal %198 {approx = true} : vector<2x8x1xf32> -> vector<2x8x1xf32>
    %200 = vector.broadcast %199 : vector<2x8x1xf32> to vector<2x8x8xf32>
    %201 = arith.mulf %196, %200 : vector<2x8x8xf32>
    %202 = vector.shape_cast %201 : vector<2x8x8xf32> to vector<16x8xf32>
    %203 = arith.truncf %202 : vector<16x8xf32> to vector<16x8xbf16>
    %c200 = arith.constant 200 : index
    %c0_59 = arith.constant 0 : index
    %204 = vector.load %arg3[%c200, %c0_59] : memref<208x128xf32, #tpu.memory_space<vmem>>, vector<8x4xf32>
    %205 = arith.truncf %204 : vector<8x4xf32> to vector<8x4xbf16>
    %cst_60 = arith.constant dense<0.000000e+00> : vector<16x4xf32>
    %206 = tpu.matmul %203, %205, %cst_60 {dimension_numbers = #tpu.dot_dimension_numbers<[1], [0], [0], [1], [0, 0, 1, 1], [], []>} : vector<16x8xbf16>, vector<8x4xbf16>, vector<16x4xf32> -> vector<16x4xf32>
    %c0_61 = arith.constant 0 : index
    %c0_62 = arith.constant 0 : index
    %207 = vector.load %arg4[%c0_61, %c0_62] : memref<16x4xf32, #tpu.memory_space<vmem>>, vector<16x4xf32>
    tpu.vector_store %arg4[%c0_61, %c0_62], %206 {strides = array<i32>} : memref<16x4xf32, #tpu.memory_space<vmem>>, vector<16x4xf32>,
    return
  }
}

</mosaic_0001>

<bundles_post_ra>
// kernel: combined_model_forward.1
= control target key start
LH: loop header
LB: loop body
LE: loop exit
PB: predicated region body
PF: predicated region fallthrough
CT: control target
= control target key end

     0   :  { %v1882_v0 = vmov 0.0   ;;  %vm1883_vm0 = vmmov 0   ;;  %vm32_vm1 = vcmask 261120   ;;  %vm82_vm2 = vcmask 64512   ;;  %s1885_s29 = smov 64   ;;  %s1886_s30 = smov 88   ;;  %s2256_s3 = inlined_call_operand.vmem [shape: f32[208,128], index: 3, kind: input, shape index: {}]   ;;  %s2257_s0 = inlined_call_operand.vmem [shape: f32[16,32], index: 0, kind: input, shape index: {}]   ;;  %s2258_s2 = inlined_call_operand.vmem [shape: f32[8,128], index: 2, kind: input, shape index: {}]   ;;  %s2259_s1 = inlined_call_operand.vmem [shape: f32[16,8], index: 1, kind: input, shape index: {}]   ;;  %s2260_s4 = inlined_call_operand.vmem [shape: f32[16,4], index: 4, kind: output, shape index: {}]  }
   0x1   :  { %1635 = vmatprep.subr.bf16.mxu0 %v1882_v0  ;;  %v21_v1 = vld [vmem:[%s2256_s3] sm:$0xff]  ;;  %v22_v2 = vld [vmem:[%s2256_s3 + $0x8] sm:$0xff]  ;;  %v23_v3 = vld [vmem:[%s2256_s3 + $0x10] sm:$0xff]  ;;  %1639 = vmatprep.mubr.msk.bf16.mxu0 %vm1883_vm0, %v1882_v0  ;;  %vm209_vm3 = vcmask 1043456   ;;  %s1887_s5 = smov 120   ;;  %s1888_s6 = smov 56  }
   0x2   :  { %v25_v4 = vpack.c.bf16 %v22_v2, %v21_v1  ;;  %v24_v5 = vld [vmem:[%s2256_s3 + $0x18] sm:$0xff]  ;;  %1643 = vmatprep.subr.bf16.mxu1 %v1882_v0  ;;  %1645 = vmatprep.mubr.msk.bf16.mxu1 %vm1883_vm0, %v1882_v0  ;;  %v1944_v7 = vld [vmem:[%s2257_s0] sm:$0xff]  ;;  %v1949_v8 = vld [vmem:[%s2257_s0 + $0x8] sm:$0xff]  ;;  %s1884_s0 = smov 96   ;;  %s1889_s7 = smov 80   ;;  %vm993_vm4 = vcmask 130048  }
   0x3   :  { %v26_v6 = vpack.c.bf16 %v24_v5, %v23_v3  ;;  %v20_v9 = vpack.c.bf16 %v1949_v8, %v1944_v7  ;;  %v1545_v10 = vld [vmem:[%s2258_s2] ss:$0 sm:$0xff]  ;;  %s1890_s8 = smov 112   ;;  %s1891_s9 = smov 48   ;;  %vm996_vm5 = vcmask 195584   ;;  %vm1174_vm6 = vcmask 523264  }
   0x4   :  { %1636 = vmatpush3.bf16.msra.mxu0 %v25_v4  ;;  %s1892_s10 = smov 72   ;;  %s1893_s11 = smov 104   ;;  %vm1538_vm7 = vcmask 31744  }
   0x5   :  { %1637 = vmatprep.subr.bf16.mxu0 %v1882_v0  ;;  %s1894_s12 = smov 40   ;;  %s1895_s13 = smov 8  }
   0x6   :  { %s1896_s14 = smov 16   ;;  %s1897_s23 = smov 24  }
   0x8   :  { %1638 = vmatpush3.bf16.msra.mxu0 %v26_v6 }
   0x9   :  { %1649 = vmatprep.subr.bf16.mxu0 %v1882_v0 }
   0xb   :  { %1640 = vmatmul.mubr.msk.bf16.vlgmr.msra.gmra.mrb[0].mxu0 %vm32_vm1, %v20_v9 }
   0xc   :  { %1651 = vmatprep.mubr.msk.bf16.mxu0 %vm1883_vm0, %v1882_v0 }
  0xde   :  { %v70_v11 = vpop.f32.mrb[0].mxu0 }
  0xdf   :  { %v71_v12 = vadd.f32 %v1545_v10, %v70_v11  ;;  %v1641_v13 = vpop.f32.mrb[1].mxu0 }
  0xe0   :  { %v73_v14 = vpop.f32.mrb[2].mxu0 }
  0xe1   :  { %v1961_v15 = vpack.c.bf16 %v71_v12, %v71_v12  ;;  %v74_v16 = vadd.f32 %v1545_v10, %v73_v14  ;;  %v1642_v17 = vpop.f32.mrb[3].mxu0 }
  0xe3   :  { %80 = vrot.lane.b32.xlu0 %v1961_v15, %s1884_s0  ;;  %v1964_v18 = vpack.c.bf16 %v74_v16, %v74_v16 }
  0xe7   :  { %130 = vrot.lane.b32.xlu0 %v1964_v18, %s1884_s0 }
 0x155   :  { %v81_v19 = vpop.permute.xlu0 %80 }
 0x156   :  { %v87_v20 = vsel %vm82_vm2, %v81_v19, 0 }
 0x157   :  { %1644 = vmatpush3.bf16.xpose.msra.mxu1 %v87_v20 }
 0x158   :  { %1655 = vmatprep.subr.bf16.mxu1 %v1882_v0 }
 0x159   :  { %v131_v21 = vpop.permute.xlu0 %130 }
 0x15a   :  { %v136_v22 = vsel %vm82_vm2, %v131_v21, 0 }
 0x15b   :  { %1650 = vmatpush3.bf16.xpose.msra.mxu0 %v136_v22 }
 0x15c   :  { %1661 = vmatprep.subr.bf16.mxu0 %v1882_v0 }
 0x15e   :  { %1646 = vmatmul.mubr.msk.bf16.vlgmr.msra.gmra.mrb[0].mxu1 %vm82_vm2, %v1961_v15 }
 0x15f   :  { %1657 = vmatprep.mubr.msk.bf16.mxu1 %vm1883_vm0, %v1882_v0 }
 0x162   :  { %1652 = vmatmul.mubr.msk.bf16.vlgmr.msra.gmra.mrb[4].mxu0 %vm82_vm2, %v1964_v18 }
 0x163   :  { %1663 = vmatprep.mubr.msk.bf16.mxu0 %vm1883_vm0, %v1882_v0 }
 0x231   :  { %v123_v23 = vpop.f32.mrb[0].mxu1 }
 0x232   :  { %v178_v24 = vmul.f32 0.35355338, %v123_v23  ;;  %v1647_v25 = vpop.f32.mrb[1].mxu1 }
 0x233   :  { %v126_v26 = vpop.f32.mrb[2].mxu1 }
 0x234   :  { %v1648_v27 = vpop.f32.mrb[3].mxu1  ;;  %v180_v28 = vsel %vm82_vm2, %v178_v24, -inf }
 0x235   :  { %181 = vmax.xlane.f32.xlu1 %v180_v28  ;;  %v172_v29 = vpop.f32.mrb[4].mxu0 }
 0x236   :  { %v179_v30 = vmul.f32 0.35355338, %v172_v29  ;;  %v1653_v31 = vpop.f32.mrb[5].mxu0 }
 0x237   :  { %v175_v32 = vpop.f32.mrb[6].mxu0 }
 0x238   :  { %v1654_v33 = vpop.f32.mrb[7].mxu0  ;;  %v183_v34 = vsel %vm82_vm2, %v179_v30, -inf }
 0x239   :  { %184 = vmax.xlane.f32.xlu1 %v183_v34 }
 0x24a   :  { %204 = vrot.lane.b32.xlu1 %v1961_v15, %s1885_s29 }
 0x24e   :  { %253 = vrot.lane.b32.xlu1 %v1964_v18, %s1885_s29 }
 0x252   :  { %303 = vrot.lane.b32.xlu1 %v1961_v15, %s1886_s30 }
 0x2c2   :  { %v182_v35 = vpop.xlane.xlu1 %181 }
 0x2c3   :  { %v186_v36 = vsub.f32 %v178_v24, %v182_v35 }
 0x2c5   :  { %v188_v37 = vmul.f32 1.442695, %v186_v36 }
 0x2c6   :  { %v185_v38 = vpop.xlane.xlu1 %184 }
 0x2c7   :  { %1834 = vpow2.f32 %v188_v37  ;;  %v187_v39 = vsub.f32 %v179_v30, %v185_v38 }
 0x2c9   :  { %v190_v40 = vmul.f32 1.442695, %v187_v39 }
 0x2ca   :  { %v205_v41 = vpop.permute.xlu1 %204 }
 0x2cb   :  { %1836 = vpow2.f32 %v190_v40  ;;  %v211_v42 = vsel %vm209_vm3, %v205_v41, 0 }
 0x2cc   :  { %1656 = vmatpush3.bf16.msra.mxu1 %v211_v42 }
 0x2cd   :  { %1667 = vmatprep.subr.bf16.mxu1 %v1882_v0 }
 0x2ce   :  { %v254_v43 = vpop.permute.xlu1 %253 }
 0x2cf   :  { %v259_v44 = vsel %vm209_vm3, %v254_v43, 0 }
 0x2d0   :  { %1662 = vmatpush3.bf16.msra.mxu0 %v259_v44 }
 0x2d1   :  { %v1835_v45 = vpop.eup %1834  ;;  %1673 = vmatprep.subr.bf16.mxu0 %v1882_v0 }
 0x2d2   :  { %v192_v46 = vsel %vm82_vm2, %v1835_v45, 0.0  ;;  %v304_v49 = vpop.permute.xlu1 %303 }
 0x2d3   :  { %193 = vadd.xlane.f32.xlu0 %v192_v46  ;;  %v309_v56 = vsel %vm82_vm2, %v304_v49, 0 }
 0x2d5   :  { %v1837_v47 = vpop.eup %1836 }
 0x2d6   :  { %v195_v48 = vsel %vm82_vm2, %v1837_v47, 0.0 }
 0x2d7   :  { %196 = vadd.xlane.f32.xlu1 %v195_v48 }
 0x2e8   :  { %353 = vrot.lane.b32.xlu1 %v1964_v18, %s1886_s30 }
 0x2e9   :  { %301 = vrot.lane.b32.xlu0 %v1961_v15, %s1887_s5 }
 0x2ec   :  { %351 = vrot.lane.b32.xlu1 %v1964_v18, %s1887_s5 }
 0x360   :  { %v194_v50 = vpop.xlane.xlu0 %193 }
 0x361   :  { %1838 = vrcp.f32 %v194_v50 }
 0x364   :  { %v197_v51 = vpop.xlane.xlu1 %196  ;;  %v302_v61 = vpop.permute.xlu0 %301 }
 0x365   :  { %1840 = vrcp.f32 %v197_v51 }
 0x368   :  { %v354_v58 = vpop.permute.xlu1 %353 }
 0x369   :  { %v359_v60 = vsel %vm82_vm2, %v354_v58, 0 }
 0x36b   :  { %v1839_v52 = vpop.eup %1838 }
 0x36c   :  { %v200_v53 = vmul.f32 %v1839_v52, %v1835_v45  ;;  %v352_v62 = vpop.permute.xlu1 %351 }
 0x36e   :  { %v202_v54 = vpack.c.bf16 %v200_v53, %v200_v53 }
 0x36f   :  { %v1841_v55 = vpop.eup %1840 }
 0x370   :  { %v201_v57 = vmul.f32 %v1841_v55, %v1837_v47  ;;  %1658 = vmatmul.mubr.msk.bf16.vlgmr.msra.gmra.mrb[4].mxu1 %vm82_vm2, %v202_v54 }
 0x371   :  { %1668 = vmatpush3.bf16.xpose.msra.mxu1 %v309_v56  ;;  %1669 = vmatprep.mubr.msk.bf16.mxu1 %vm1883_vm0, %v1882_v0 }
 0x372   :  { %v203_v59 = vpack.c.bf16 %v201_v57, %v201_v57  ;;  %1679 = vmatprep.subr.bf16.mxu1 %v1882_v0 }
 0x374   :  { %1664 = vmatmul.mubr.msk.bf16.vlgmr.msra.gmra.mrb[8].mxu0 %vm82_vm2, %v203_v59 }
 0x375   :  { %1674 = vmatpush3.bf16.xpose.msra.mxu0 %v359_v60  ;;  %1675 = vmatprep.mubr.msk.bf16.mxu0 %vm1883_vm0, %v1882_v0 }
 0x376   :  { %1685 = vmatprep.subr.bf16.mxu0 %v1882_v0 }
 0x378   :  { %1670 = vmatmul.mubr.msk.bf16.vlgmr.msra.gmra.mrb[8].mxu1 %vm82_vm2, %v302_v61 }
 0x379   :  { %1681 = vmatprep.mubr.msk.bf16.mxu1 %vm1883_vm0, %v1882_v0 }
 0x37c   :  { %1676 = vmatmul.mubr.msk.bf16.vlgmr.msra.gmra.mrb[12].mxu0 %vm82_vm2, %v352_v62 }
 0x37d   :  { %1687 = vmatprep.mubr.msk.bf16.mxu0 %vm1883_vm0, %v1882_v0 }
 0x443   :  { %v2009_v63 = vpop.f32.mrb[4].mxu1 }
 0x444   :  { %v1659_v1 = vpop.f32.mrb[5].mxu1 }
 0x445   :  { %v250_v2 = vpop.f32.mrb[6].mxu1 }
 0x446   :  { %v1660_v3 = vpop.f32.mrb[7].mxu1 }
 0x447   :  { %v2011_v4 = vpop.f32.mrb[8].mxu0 }
 0x448   :  { %v1665_v5 = vpop.f32.mrb[9].mxu0 }
 0x449   :  { %v298_v6 = vpop.f32.mrb[10].mxu0 }
 0x44a   :  { %v1666_v9 = vpop.f32.mrb[11].mxu0 }
 0x44b   :  { %v345_v10 = vpop.f32.mrb[8].mxu1 }
 0x44c   :  { %v401_v11 = vmul.f32 0.35355338, %v345_v10  ;;  %v1671_v12 = vpop.f32.mrb[9].mxu1 }
 0x44d   :  { %v348_v13 = vpop.f32.mrb[10].mxu1 }
 0x44e   :  { %v1672_v14 = vpop.f32.mrb[11].mxu1  ;;  %v403_v16 = vsel %vm82_vm2, %v401_v11, -inf }
 0x44f   :  { %404 = vmax.xlane.f32.xlu1 %v403_v16  ;;  %v395_v17 = vpop.f32.mrb[12].mxu0 }
 0x450   :  { %v402_v19 = vmul.f32 0.35355338, %v395_v17  ;;  %v1677_v20 = vpop.f32.mrb[13].mxu0 }
 0x451   :  { %v398_v21 = vpop.f32.mrb[14].mxu0 }
 0x452   :  { %v1678_v22 = vpop.f32.mrb[15].mxu0  ;;  %v406_v23 = vsel %vm82_vm2, %v402_v19, -inf }
 0x453   :  { %407 = vmax.xlane.f32.xlu0 %v406_v23 }
 0x460   :  { %427 = vrot.lane.b32.xlu1 %v1961_v15, %s1888_s6 }
 0x464   :  { %525 = vrot.lane.b32.xlu1 %v1961_v15, %s1889_s7 }
 0x469   :  { %475 = vrot.lane.b32.xlu0 %v1964_v18, %s1888_s6 }
 0x46d   :  { %523 = vrot.lane.b32.xlu0 %v1961_v15, %s1890_s8 }
 0x4dc   :  { %v405_v24 = vpop.xlane.xlu1 %404 }
 0x4dd   :  { %v409_v25 = vsub.f32 %v401_v11, %v405_v24 }
 0x4df   :  { %v411_v26 = vmul.f32 1.442695, %v409_v25 }
 0x4e0   :  { %v428_v27 = vpop.permute.xlu1 %427  ;;  %v408_v28 = vpop.xlane.xlu0 %407 }
 0x4e1   :  { %1842 = vpow2.f32 %v411_v26  ;;  %v433_v29 = vsel %vm209_vm3, %v428_v27, 0  ;;  %v410_v30 = vsub.f32 %v402_v19, %v408_v28 }
 0x4e2   :  { %1680 = vmatpush3.bf16.msra.mxu1 %v433_v29 }
 0x4e3   :  { %v413_v31 = vmul.f32 1.442695, %v410_v30  ;;  %1691 = vmatprep.subr.bf16.mxu1 %v1882_v0 }
 0x4e4   :  { %v476_v32 = vpop.permute.xlu0 %475  ;;  %v526_v38 = vpop.permute.xlu1 %525 }
 0x4e5   :  { %1844 = vpow2.f32 %v413_v31  ;;  %v481_v33 = vsel %vm209_vm3, %v476_v32, 0  ;;  %v531_v45 = vsel %vm82_vm2, %v526_v38, 0 }
 0x4e6   :  { %1686 = vmatpush3.bf16.msra.mxu0 %v481_v33 }
 0x4e7   :  { %1697 = vmatprep.subr.bf16.mxu0 %v1882_v0 }
 0x4e8   :  { %v524_v50 = vpop.permute.xlu0 %523 }
 0x4eb   :  { %v1843_v34 = vpop.eup %1842 }
 0x4ec   :  { %v415_v35 = vsel %vm82_vm2, %v1843_v34, 0.0 }
 0x4ed   :  { %416 = vadd.xlane.f32.xlu1 %v415_v35 }
 0x4ef   :  { %v1845_v36 = vpop.eup %1844 }
 0x4f0   :  { %v418_v37 = vsel %vm82_vm2, %v1845_v36, 0.0 }
 0x4f1   :  { %419 = vadd.xlane.f32.xlu1 %v418_v37 }
 0x502   :  { %575 = vrot.lane.b32.xlu1 %v1964_v18, %s1889_s7 }
 0x506   :  { %573 = vrot.lane.b32.xlu1 %v1964_v18, %s1890_s8 }
 0x57a   :  { %v417_v39 = vpop.xlane.xlu1 %416 }
 0x57b   :  { %1846 = vrcp.f32 %v417_v39 }
 0x57e   :  { %v420_v40 = vpop.xlane.xlu1 %419 }
 0x57f   :  { %1848 = vrcp.f32 %v420_v40 }
 0x582   :  { %v576_v47 = vpop.permute.xlu1 %575 }
 0x583   :  { %v581_v49 = vsel %vm82_vm2, %v576_v47, 0 }
 0x585   :  { %v1847_v41 = vpop.eup %1846 }
 0x586   :  { %v423_v42 = vmul.f32 %v1847_v41, %v1843_v34  ;;  %v574_v51 = vpop.permute.xlu1 %573 }
 0x588   :  { %v425_v43 = vpack.c.bf16 %v423_v42, %v423_v42 }
 0x589   :  { %v1849_v44 = vpop.eup %1848 }
 0x58a   :  { %v424_v46 = vmul.f32 %v1849_v44, %v1845_v36  ;;  %1682 = vmatmul.mubr.msk.bf16.vlgmr.msra.gmra.mrb[12].mxu1 %vm82_vm2, %v425_v43 }
 0x58b   :  { %1692 = vmatpush3.bf16.xpose.msra.mxu1 %v531_v45  ;;  %1693 = vmatprep.mubr.msk.bf16.mxu1 %vm1883_vm0, %v1882_v0 }
 0x58c   :  { %v426_v48 = vpack.c.bf16 %v424_v46, %v424_v46  ;;  %1703 = vmatprep.subr.bf16.mxu1 %v1882_v0 }
 0x58e   :  { %1688 = vmatmul.mubr.msk.bf16.vlgmr.msra.gmra.mrb[16].mxu0 %vm82_vm2, %v426_v48 }
 0x58f   :  { %1698 = vmatpush3.bf16.xpose.msra.mxu0 %v581_v49  ;;  %1699 = vmatprep.mubr.msk.bf16.mxu0 %vm1883_vm0, %v1882_v0 }
 0x590   :  { %1709 = vmatprep.subr.bf16.mxu0 %v1882_v0 }
 0x592   :  { %1694 = vmatmul.mubr.msk.bf16.vlgmr.msra.gmra.mrb[16].mxu1 %vm82_vm2, %v524_v50 }
 0x593   :  { %1705 = vmatprep.mubr.msk.bf16.mxu1 %vm1883_vm0, %v1882_v0 }
 0x596   :  { %1700 = vmatmul.mubr.msk.bf16.vlgmr.msra.gmra.mrb[20].mxu0 %vm82_vm2, %v574_v51 }
 0x597   :  { %1711 = vmatprep.mubr.msk.bf16.mxu0 %vm1883_vm0, %v1882_v0 }
 0x65d   :  { %v2045_v52 = vpop.f32.mrb[12].mxu1 }
 0x65e   :  { %v1683_v53 = vpop.f32.mrb[13].mxu1 }
 0x65f   :  { %v472_v54 = vpop.f32.mrb[14].mxu1 }
 0x660   :  { %v1684_v55 = vpop.f32.mrb[15].mxu1 }
 0x661   :  { %v2047_v56 = vpop.f32.mrb[16].mxu0 }
 0x662   :  { %v1819_v57 = vpack.i.bf16 %v2047_v56, %v2045_v52  ;;  %v1689_v58 = vpop.f32.mrb[17].mxu0 }
 0x663   :  { %v520_v59 = vpop.f32.mrb[18].mxu0 }
 0x664   :  { %v1690_v60 = vpop.f32.mrb[19].mxu0 }
 0x665   :  { %v567_v61 = vpop.f32.mrb[16].mxu1 }
 0x666   :  { %v623_v62 = vmul.f32 0.35355338, %v567_v61  ;;  %v1695_v1 = vpop.f32.mrb[17].mxu1 }
 0x667   :  { %v570_v2 = vpop.f32.mrb[18].mxu1 }
 0x668   :  { %v1696_v3 = vpop.f32.mrb[19].mxu1  ;;  %v625_v5 = vsel %vm82_vm2, %v623_v62, -inf }
 0x669   :  { %626 = vmax.xlane.f32.xlu0 %v625_v5  ;;  %v617_v6 = vpop.f32.mrb[20].mxu0 }
 0x66a   :  { %v624_v9 = vmul.f32 0.35355338, %v617_v6  ;;  %v1701_v10 = vpop.f32.mrb[21].mxu0 }
 0x66b   :  { %v620_v11 = vpop.f32.mrb[22].mxu0 }
 0x66c   :  { %v1702_v12 = vpop.f32.mrb[23].mxu0  ;;  %v628_v13 = vsel %vm82_vm2, %v624_v9, -inf }
 0x66d   :  { %629 = vmax.xlane.f32.xlu1 %v628_v13 }
 0x67e   :  { %649 = vrot.lane.b32.xlu1 %v1961_v15, %s1891_s9 }
 0x682   :  { %747 = vrot.lane.b32.xlu1 %v1961_v15, %s1892_s10 }
 0x686   :  { %797 = vrot.lane.b32.xlu1 %v1964_v18, %s1892_s10 }
 0x68a   :  { %795 = vrot.lane.b32.xlu1 %v1964_v18, %s1893_s11 }
 0x6f6   :  { %v627_v14 = vpop.xlane.xlu0 %626 }
 0x6f7   :  { %v631_v16 = vsub.f32 %v623_v62, %v627_v14 }
 0x6f9   :  { %v633_v17 = vmul.f32 1.442695, %v631_v16 }
 0x6fa   :  { %v630_v19 = vpop.xlane.xlu1 %629 }
 0x6fb   :  { %1850 = vpow2.f32 %v633_v17  ;;  %v632_v20 = vsub.f32 %v624_v9, %v630_v19 }
 0x6fd   :  { %v635_v21 = vmul.f32 1.442695, %v632_v20 }
 0x6fe   :  { %v650_v22 = vpop.permute.xlu1 %649 }
 0x6ff   :  { %1852 = vpow2.f32 %v635_v21  ;;  %v655_v23 = vsel %vm209_vm3, %v650_v22, 0 }
 0x700   :  { %1704 = vmatpush3.bf16.msra.mxu1 %v655_v23 }
 0x701   :  { %1715 = vmatprep.subr.bf16.mxu1 %v1882_v0 }
 0x702   :  { %v748_v33 = vpop.permute.xlu1 %747 }
 0x703   :  { %v753_v37 = vsel %vm82_vm2, %v748_v33, 0 }
 0x705   :  { %v1851_v24 = vpop.eup %1850 }
 0x706   :  { %v637_v25 = vsel %vm82_vm2, %v1851_v24, 0.0  ;;  %v798_v39 = vpop.permute.xlu1 %797 }
 0x707   :  { %638 = vadd.xlane.f32.xlu0 %v637_v25  ;;  %v803_v41 = vsel %vm82_vm2, %v798_v39, 0 }
 0x709   :  { %v1853_v26 = vpop.eup %1852 }
 0x70a   :  { %v640_v27 = vsel %vm82_vm2, %v1853_v26, 0.0  ;;  %v796_v43 = vpop.permute.xlu1 %795 }
 0x70b   :  { %641 = vadd.xlane.f32.xlu0 %v640_v27 }
 0x721   :  { %697 = vrot.lane.b32.xlu0 %v1964_v18, %s1891_s9 }
 0x725   :  { %745 = vrot.lane.b32.xlu0 %v1961_v15, %s1893_s11 }
 0x794   :  { %v639_v28 = vpop.xlane.xlu0 %638 }
 0x795   :  { %1854 = vrcp.f32 %v639_v28  ;;  %v1000_v28 = vld [vmem:[%s2256_s3 + $0x20] sm:$0xff] }
 0x798   :  { %v642_v29 = vpop.xlane.xlu0 %641 }
 0x799   :  { %1856 = vrcp.f32 %v642_v29  ;;  %v1001_v29 = vld [vmem:[%s2256_s3 + $0x28] sm:$0xff] }
 0x79c   :  { %v698_v30 = vpop.permute.xlu0 %697 }
 0x79d   :  { %v703_v31 = vsel %vm209_vm3, %v698_v30, 0  ;;  %v1004_v30 = vpack.c.bf16 %v1001_v29, %v1000_v28 }
 0x79e   :  { %1710 = vmatpush3.bf16.msra.mxu0 %v703_v31  ;;  %v1002_v31 = vld [vmem:[%s2256_s3 + $0x30] sm:$0xff] }
 0x79f   :  { %v1855_v32 = vpop.eup %1854  ;;  %1721 = vmatprep.subr.bf16.mxu0 %v1882_v0 }
 0x7a0   :  { %v645_v34 = vmul.f32 %v1855_v32, %v1851_v24  ;;  %v746_v42 = vpop.permute.xlu0 %745  ;;  %v1003_v32 = vld [vmem:[%s2256_s3 + $0x38] sm:$0xff] }
 0x7a1   :  { %v1005_v33 = vpack.c.bf16 %v1003_v32, %v1002_v31 }
 0x7a2   :  { %v647_v35 = vpack.c.bf16 %v645_v34, %v645_v34 }
 0x7a3   :  { %v1857_v36 = vpop.eup %1856 }
 0x7a4   :  { %v646_v38 = vmul.f32 %v1857_v36, %v1853_v26  ;;  %1706 = vmatmul.mubr.msk.bf16.vlgmr.msra.gmra.mrb[20].mxu1 %vm82_vm2, %v647_v35 }
 0x7a5   :  { %1716 = vmatpush3.bf16.xpose.msra.mxu1 %v753_v37  ;;  %1717 = vmatprep.mubr.msk.bf16.mxu1 %vm1883_vm0, %v1882_v0 }
 0x7a6   :  { %v648_v40 = vpack.c.bf16 %v646_v38, %v646_v38  ;;  %1727 = vmatprep.subr.bf16.mxu1 %v1882_v0 }
 0x7a8   :  { %1712 = vmatmul.mubr.msk.bf16.vlgmr.msra.gmra.mrb[24].mxu0 %vm82_vm2, %v648_v40 }
 0x7a9   :  { %1722 = vmatpush3.bf16.xpose.msra.mxu0 %v803_v41  ;;  %1723 = vmatprep.mubr.msk.bf16.mxu0 %vm1883_vm0, %v1882_v0 }
 0x7aa   :  { %1733 = vmatprep.subr.bf16.mxu0 %v1882_v0 }
 0x7ac   :  { %1718 = vmatmul.mubr.msk.bf16.vlgmr.msra.gmra.mrb[24].mxu1 %vm82_vm2, %v746_v42 }
 0x7ad   :  { %1729 = vmatprep.mubr.msk.bf16.mxu1 %vm1883_vm0, %v1882_v0 }
 0x7b0   :  { %1724 = vmatmul.mubr.msk.bf16.vlgmr.msra.gmra.mrb[28].mxu0 %vm82_vm2, %v796_v43 }
 0x7b1   :  { %1735 = vmatprep.mubr.msk.bf16.mxu0 %vm1883_vm0, %v1882_v0 }
 0x877   :  { %v691_v44 = vpop.f32.mrb[20].mxu1 }
 0x878   :  { %v1707_v45 = vpop.f32.mrb[21].mxu1 }
 0x879   :  { %v694_v46 = vpop.f32.mrb[22].mxu1 }
 0x87a   :  { %v1708_v47 = vpop.f32.mrb[23].mxu1 }
 0x87b   :  { %v739_v48 = vpop.f32.mrb[24].mxu0 }
 0x87c   :  { %v1824_v49 = vpack.i.bf16 %v739_v48, %v691_v44  ;;  %v1713_v50 = vpop.f32.mrb[25].mxu0 }
 0x87d   :  { %v742_v51 = vpop.f32.mrb[26].mxu0 }
 0x87e   :  { %v1714_v53 = vpop.f32.mrb[27].mxu0 }
 0x87f   :  { %v789_v54 = vpop.f32.mrb[24].mxu1 }
 0x880   :  { %v845_v55 = vmul.f32 0.35355338, %v789_v54  ;;  %v1719_v58 = vpop.f32.mrb[25].mxu1 }
 0x881   :  { %v792_v59 = vpop.f32.mrb[26].mxu1 }
 0x882   :  { %v1720_v60 = vpop.f32.mrb[27].mxu1  ;;  %v847_v61 = vsel %vm82_vm2, %v845_v55, -inf }
 0x883   :  { %848 = vmax.xlane.f32.xlu0 %v847_v61  ;;  %v839_v62 = vpop.f32.mrb[28].mxu0 }
 0x884   :  { %v846_v1 = vmul.f32 0.35355338, %v839_v62  ;;  %v1725_v2 = vpop.f32.mrb[29].mxu0 }
 0x885   :  { %v842_v3 = vpop.f32.mrb[30].mxu0 }
 0x886   :  { %v1726_v5 = vpop.f32.mrb[31].mxu0  ;;  %v850_v6 = vsel %vm82_vm2, %v846_v1, -inf }
 0x887   :  { %851 = vmax.xlane.f32.xlu1 %v850_v6 }
 0x898   :  { %871 = vrot.lane.b32.xlu1 %v1961_v15, %s1894_s12 }
 0x89c   :  { %1820 = vrot.lane.b32.xlu1 %v1819_v57, %s1895_s13 }
 0x8a0   :  { %1825 = vrot.lane.b32.xlu1 %v1824_v49, %s1896_s14 }
 0x910   :  { %v849_v9 = vpop.xlane.xlu0 %848 }
 0x911   :  { %v853_v10 = vsub.f32 %v845_v55, %v849_v9 }
 0x913   :  { %v855_v11 = vmul.f32 1.442695, %v853_v10 }
 0x914   :  { %v852_v12 = vpop.xlane.xlu1 %851 }
 0x915   :  { %1858 = vpow2.f32 %v855_v11  ;;  %v854_v13 = vsub.f32 %v846_v1, %v852_v12 }
 0x917   :  { %v857_v14 = vmul.f32 1.442695, %v854_v13 }
 0x918   :  { %v872_v16 = vpop.permute.xlu1 %871 }
 0x919   :  { %1860 = vpow2.f32 %v857_v14  ;;  %v877_v17 = vsel %vm209_vm3, %v872_v16, 0 }
 0x91a   :  { %1728 = vmatpush3.bf16.msra.mxu1 %v877_v17 }
 0x91b   :  { %1739 = vmatprep.subr.bf16.mxu1 %v1882_v0 }
 0x91c   :  { %v1821_v43 = vpop.permute.xlu1 %1820 }
 0x91d   :  { %v1823_v45 = vunpack.i.h.bf16 %v1821_v43  ;;  %v1822_v46 = vunpack.i.l.bf16 %v1821_v43 }
 0x91f   :  { %v1859_v15 = vpop.eup %1858  ;;  %v992_v50 = vsel %vm82_vm2, %v2011_v4, %v1823_v45  ;;  %v991_v51 = vsel %vm82_vm2, %v2009_v63, %v1822_v46  ;;  %v1563_v4 = vld [vmem:[%s2258_s2 + $0x1] ss:$0 sm:$0xff] }
 0x920   :  { %v859_v52 = vsel %vm82_vm2, %v1859_v15, 0.0  ;;  %v1826_v44 = vpop.permute.xlu1 %1825  ;;  %v1161_v46 = vld [vmem:[%s2256_s3 + $0x80] sm:$0xff] }
 0x921   :  { %860 = vadd.xlane.f32.xlu0 %v859_v52  ;;  %v1828_v47 = vunpack.i.h.bf16 %v1826_v44  ;;  %v1827_v48 = vunpack.i.l.bf16 %v1826_v44 }
 0x923   :  { %v1861_v56 = vpop.eup %1860  ;;  %v994_v55 = vsel %vm993_vm4, %v991_v51, %v1827_v48  ;;  %v995_v58 = vsel %vm993_vm4, %v992_v50, %v1828_v47  ;;  %v1162_v47 = vld [vmem:[%s2256_s3 + $0x88] sm:$0xff]  ;;  %v1164_v50 = vld [vmem:[%s2256_s3 + $0x98] sm:$0xff] }
 0x924   :  { %v862_v57 = vsel %vm82_vm2, %v1861_v56, 0.0  ;;  %v1167_v48 = vpack.c.bf16 %v1162_v47, %v1161_v46  ;;  %v1261_v46 = vld [vmem:[%s2259_s1] sm:$0xff]  ;;  %v1262_v47 = vld [vmem:[%s2259_s1 + $0x8] sm:$0xff] }
 0x925   :  { %863 = vadd.xlane.f32.xlu0 %v862_v57 }
 0x93b   :  { %919 = vrot.lane.b32.xlu0 %v1964_v18, %s1894_s12 }
 0x9ae   :  { %v861_v19 = vpop.xlane.xlu0 %860 }
 0x9af   :  { %1862 = vrcp.f32 %v861_v19  ;;  %v1100_v19 = vld [vmem:[%s2256_s3 + $0x48] sm:$0xff] }
 0x9b2   :  { %v864_v20 = vpop.xlane.xlu0 %863 }
 0x9b3   :  { %1864 = vrcp.f32 %v864_v20 }
 0x9b6   :  { %v920_v21 = vpop.permute.xlu0 %919 }
 0x9b7   :  { %v925_v22 = vsel %vm209_vm3, %v920_v21, 0  ;;  %v1101_v21 = vld [vmem:[%s2256_s3 + $0x50] sm:$0xff] }
 0x9b8   :  { %1734 = vmatpush3.bf16.msra.mxu0 %v925_v22  ;;  %v1102_v22 = vld [vmem:[%s2256_s3 + $0x58] sm:$0xff] }
 0x9b9   :  { %v1863_v23 = vpop.eup %1862  ;;  %1747 = vmatprep.subr.bf16.mxu0 %v1882_v0 }
 0x9ba   :  { %v867_v24 = vmul.f32 %v1863_v23, %v1859_v15  ;;  %v1104_v23 = vpack.c.bf16 %v1102_v22, %v1101_v21  ;;  %v1267_v21 = vld [vmem:[%s2256_s3 + $0xa8] sm:$0xff]  ;;  %v1268_v22 = vld [vmem:[%s2256_s3 + $0xb0] sm:$0xff] }
 0x9bc   :  { %v869_v25 = vpack.c.bf16 %v867_v24, %v867_v24  ;;  %v1157_v24 = vld [vmem:[%s2256_s3 + $0x60] sm:$0xff] }
 0x9bd   :  { %v1865_v26 = vpop.eup %1864 }
 0x9be   :  { %v868_v27 = vmul.f32 %v1865_v26, %v1861_v56  ;;  %1730 = vmatmul.mubr.msk.bf16.vlgmr.msra.gmra.mrb[28].mxu1 %vm82_vm2, %v869_v25  ;;  %v1158_v25 = vld [vmem:[%s2256_s3 + $0x68] sm:$0xff]  ;;  %v1159_v26 = vld [vmem:[%s2256_s3 + $0x70] sm:$0xff] }
 0x9bf   :  { %1743 = vmatprep.mubr.msk.bf16.mxu1 %vm1883_vm0, %v1882_v0  ;;  %1740 = vmatpush3.bf16.msra.mxu1 %v1004_v30 }
 0x9c0   :  { %v870_v18 = vpack.c.bf16 %v868_v27, %v868_v27  ;;  %1741 = vmatprep.subr.bf16.mxu1 %v1882_v0  ;;  %v1165_v27 = vpack.c.bf16 %v1158_v25, %v1157_v24  ;;  %v1269_v24 = vld [vmem:[%s2256_s3 + $0xb8] sm:$0xff]  ;;  %v1270_v25 = vld [vmem:[%s2256_s3 + $0xc0] sm:$0xff] }
 0x9c2   :  { %1736 = vmatmul.mubr.msk.bf16.vlgmr.msra.gmra.mrb[32].mxu0 %vm82_vm2, %v870_v18  ;;  %v1160_v18 = vld [vmem:[%s2256_s3 + $0x78] sm:$0xff] }
 0x9c3   :  { %1751 = vmatprep.mubr.msk.bf16.mxu0 %vm1883_vm0, %v1882_v0  ;;  %1742 = vmatpush3.bf16.msra.mxu1 %v1005_v33  ;;  %v1166_v28 = vpack.c.bf16 %v1160_v18, %v1159_v26  ;;  %v1272_v26 = vpack.c.bf16 %v1270_v25, %v1269_v24 }
 0x9c4   :  { %1755 = vmatprep.subr.bf16.mxu1 %v1882_v0 }
 0xa91   :  { %v913_v34 = vpop.f32.mrb[28].mxu1 }
 0xa92   :  { %v1731_v35 = vpop.f32.mrb[29].mxu1 }
 0xa93   :  { %v916_v36 = vpop.f32.mrb[30].mxu1 }
 0xa94   :  { %v1732_v37 = vpop.f32.mrb[31].mxu1  ;;  %v1565_v36 = vld [vmem:[%s2258_s2 + $0x2] ss:$0 sm:$0xff] }
 0xa95   :  { %v961_v38 = vpop.f32.mrb[32].mxu0 }
 0xa96   :  { %v1829_v39 = vpack.i.bf16 %v961_v38, %v913_v34  ;;  %v1737_v40 = vpop.f32.mrb[33].mxu0 }
 0xa97   :  { %v964_v41 = vpop.f32.mrb[34].mxu0 }
 0xa98   :  { %1830 = vrot.lane.b32.xlu0 %v1829_v39, %s1897_s23  ;;  %v1738_v42 = vpop.f32.mrb[35].mxu0  ;;  %v1566_v41 = vld [vmem:[%s2258_s2 + $0x3] ss:$0 sm:$0xff] }
 0xb0a   :  { %v1831_v49 = vpop.permute.xlu0 %1830 }
 0xb0b   :  { %v1833_v53 = vunpack.i.h.bf16 %v1831_v49  ;;  %v1832_v54 = vunpack.i.l.bf16 %v1831_v49  ;;  %v1163_v49 = vld [vmem:[%s2256_s3 + $0x90] sm:$0xff] }
 0xb0c   :  { %v1168_v51 = vpack.c.bf16 %v1164_v50, %v1163_v49 }
 0xb0d   :  { %v998_v59 = vsel %vm996_vm5, %v995_v58, %v1833_v53  ;;  %v997_v60 = vsel %vm996_vm5, %v994_v55, %v1832_v54  ;;  %v1567_v53 = vld [vmem:[%s2258_s2 + $0x4] ss:$0 sm:$0xff] }
 0xb0e   :  { %v999_v61 = vpack.c.bf16 %v998_v59, %v997_v60 }
 0xb10   :  { %1744 = vmatmul.mubr.msk.bf16.vlgmr.msra.gmra.mrb[32].mxu1 %vm32_vm1, %v999_v61 }
 0xb11   :  { %1763 = vmatprep.mubr.msk.bf16.mxu1 %vm1883_vm0, %v1882_v0  ;;  %1756 = vmatpush3.bf16.msra.mxu1 %v1165_v27 }
 0xb12   :  { %1757 = vmatprep.subr.bf16.mxu1 %v1882_v0 }
 0xb15   :  { %1758 = vmatpush3.bf16.msra.mxu1 %v1166_v28 }
 0xb16   :  { %1759 = vmatprep.subr.bf16.mxu1 %v1882_v0 }
 0xb19   :  { %1760 = vmatpush3.bf16.msra.mxu1 %v1167_v48  ;;  %v1263_v48 = vpack.c.bf16 %v1262_v47, %v1261_v46 }
 0xb1a   :  { %1761 = vmatprep.subr.bf16.mxu1 %v1882_v0 }
 0xb1d   :  { %1762 = vmatpush3.bf16.msra.mxu1 %v1168_v51 }
 0xb1e   :  { %1781 = vmatprep.subr.bf16.mxu1 %v1882_v0 }
 0xbe3   :  { %v1048_v62 = vpop.f32.mrb[32].mxu1 }
 0xbe4   :  { %v1049_v63 = vadd.f32 %v1563_v4, %v1048_v62  ;;  %v1745_v1 = vpop.f32.mrb[33].mxu1 }
 0xbe5   :  { %v1051_v2 = vpop.f32.mrb[34].mxu1  ;;  %v1569_v1 = vld [vmem:[%s2258_s2 + $0x5] ss:$0 sm:$0xff] }
 0xbe6   :  { %v1052_v3 = vadd.f32 %v1563_v4, %v1051_v2  ;;  %v1746_v5 = vpop.f32.mrb[35].mxu1  ;;  %v1055_v6 = vadd.f32 %v1049_v63, %v1944_v7 }
 0xbe8   :  { %v1059_v9 = vsel %vm32_vm1, %v1055_v6, 0.0  ;;  %v1056_v10 = vadd.f32 %v1052_v3, %v1949_v8  ;;  %v1099_v8 = vld [vmem:[%s2256_s3 + $0x40] sm:$0xff] }
 0xbe9   :  { %1060 = vadd.xlane.f32.xlu1 %v1059_v9  ;;  %v1103_v20 = vpack.c.bf16 %v1100_v19, %v1099_v8 }
 0xbea   :  { %v1062_v11 = vsel %vm32_vm1, %v1056_v10, 0.0 }
 0xbeb   :  { %1063 = vadd.xlane.f32.xlu0 %v1062_v11  ;;  %1748 = vmatpush3.bf16.msra.mxu0 %v1103_v20 }
 0xbec   :  { %1749 = vmatprep.subr.bf16.mxu0 %v1882_v0 }
 0xbef   :  { %1750 = vmatpush3.bf16.msra.mxu0 %v1104_v23  ;;  %v1271_v23 = vpack.c.bf16 %v1268_v22, %v1267_v21 }
 0xbf0   :  { %1767 = vmatprep.subr.bf16.mxu0 %v1882_v0 }
 0xc76   :  { %v1061_v12 = vpop.xlane.xlu1 %1060 }
 0xc77   :  { %v1066_v13 = vmul.f32 0.03125, %v1061_v12 }
 0xc78   :  { %v1064_v14 = vpop.xlane.xlu0 %1063 }
 0xc79   :  { %v1068_v16 = vsub.f32 %v1055_v6, %v1066_v13  ;;  %v1067_v17 = vmul.f32 0.03125, %v1064_v14 }
 0xc7b   :  { %v1069_v15 = vsub.f32 %v1056_v10, %v1067_v17  ;;  %v1070_v52 = vmul.f32 %v1068_v16, %v1068_v16 }
 0xc7d   :  { %v1072_v56 = vsel %vm32_vm1, %v1070_v52, 0.0  ;;  %v1071_v57 = vmul.f32 %v1069_v15, %v1069_v15 }
 0xc7e   :  { %1073 = vadd.xlane.f32.xlu0 %v1072_v56 }
 0xc7f   :  { %v1075_v7 = vsel %vm32_vm1, %v1071_v57, 0.0 }
 0xc80   :  { %1076 = vadd.xlane.f32.xlu1 %v1075_v7 }
 0xd0b   :  { %v1074_v29 = vpop.xlane.xlu0 %1073 }
 0xd0c   :  { %v1078_v30 = vmul.f32 0.03125, %v1074_v29 }
 0xd0d   :  { %v1077_v31 = vpop.xlane.xlu1 %1076 }
 0xd0e   :  { %v1080_v32 = vadd.f32 1e-05, %v1078_v30  ;;  %v1079_v33 = vmul.f32 0.03125, %v1077_v31 }
 0xd10   :  { %1866 = vrsqrt.f32 %v1080_v32  ;;  %v1081_v34 = vadd.f32 1e-05, %v1079_v33  ;;  %v1571_v33 = vld [vmem:[%s2258_s2 + $0x6] ss:$0 sm:$0xff] }
 0xd12   :  { %1868 = vrsqrt.f32 %v1081_v34 }
 0xd1a   :  { %v1867_v35 = vpop.eup %1866 }
 0xd1b   :  { %v1084_v37 = vmul.f32 %v1867_v35, %v1068_v16 }
 0xd1c   :  { %v1869_v38 = vpop.eup %1868 }
 0xd1d   :  { %v1090_v39 = vmul.f32 %v1565_v36, %v1084_v37  ;;  %v1085_v40 = vmul.f32 %v1869_v38, %v1069_v15 }
 0xd1f   :  { %v1091_v42 = vmul.f32 %v1565_v36, %v1085_v40  ;;  %v1096_v43 = vadd.f32 %v1566_v41, %v1090_v39  ;;  %v1264_v36 = vld [vmem:[%s2256_s3 + $0xa0] sm:$0xff] }
 0xd20   :  { %v1572_v39 = vld [vmem:[%s2258_s2 + $0x7] ss:$0 sm:$0xff] }
 0xd21   :  { %v1097_v44 = vadd.f32 %v1566_v41, %v1091_v42  ;;  %v1265_v41 = vpack.c.bf16 %v1264_v36, %v1264_v36 }
 0xd23   :  { %v1098_v45 = vpack.c.bf16 %v1097_v44, %v1096_v43 }
 0xd25   :  { %1752 = vmatmul.mubr.msk.bf16.vlgmr.msra.gmra.mrb[36].mxu0 %vm32_vm1, %v1098_v45  ;;  %v1321_v45 = vsel %vm209_vm3, %v1265_v41, 0 }
 0xd26   :  { %1771 = vmatprep.mubr.msk.bf16.mxu0 %vm1883_vm0, %v1882_v0  ;;  %1768 = vmatpush3.bf16.msra.mxu0 %v1271_v23 }
 0xd27   :  { %1769 = vmatprep.subr.bf16.mxu0 %v1882_v0 }
 0xd2a   :  { %1770 = vmatpush3.bf16.msra.mxu0 %v1272_v26 }
 0xd2b   :  { %1775 = vmatprep.subr.bf16.mxu0 %v1882_v0 }
 0xdf8   :  { %v1147_v54 = vpop.f32.mrb[36].mxu0 }
 0xdf9   :  { %v1148_v55 = vadd.f32 %v1567_v53, %v1147_v54  ;;  %v1753_v58 = vpop.f32.mrb[37].mxu0 }
 0xdfa   :  { %v1150_v59 = vpop.f32.mrb[38].mxu0 }
 0xdfb   :  { %v1151_v60 = vadd.f32 %v1567_v53, %v1150_v59  ;;  %v1754_v61 = vpop.f32.mrb[39].mxu0  ;;  %v1154_v4 = vmax.f32 %v1148_v55, 0.0 }
 0xdfd   :  { %v1155_v62 = vmax.f32 %v1151_v60, 0.0 }
 0xdff   :  { %v1156_v63 = vpack.c.bf16 %v1155_v62, %v1154_v4 }
 0xe01   :  { %1764 = vmatmul.mubr.msk.bf16.vlgmr.msra.gmra.mrb[36].mxu1 %vm1174_vm6, %v1156_v63 }
 0xe02   :  { %1783 = vmatprep.mubr.msk.bf16.mxu1 %vm1883_vm0, %v1882_v0 }
 0xed4   :  { %v1212_v2 = vpop.f32.mrb[36].mxu1 }
 0xed5   :  { %v1213_v3 = vadd.f32 %v1569_v1, %v1212_v2  ;;  %v1765_v5 = vpop.f32.mrb[37].mxu1 }
 0xed6   :  { %v1215_v6 = vpop.f32.mrb[38].mxu1 }
 0xed7   :  { %v1216_v9 = vadd.f32 %v1569_v1, %v1215_v6  ;;  %v1766_v10 = vpop.f32.mrb[39].mxu1  ;;  %v1219_v11 = vadd.f32 %v1213_v3, %v1096_v43 }
 0xed9   :  { %v1223_v12 = vsel %vm32_vm1, %v1219_v11, 0.0  ;;  %v1220_v13 = vadd.f32 %v1216_v9, %v1097_v44 }
 0xeda   :  { %1224 = vadd.xlane.f32.xlu0 %v1223_v12 }
 0xedb   :  { %v1226_v14 = vsel %vm32_vm1, %v1220_v13, 0.0 }
 0xedc   :  { %1227 = vadd.xlane.f32.xlu1 %v1226_v14 }
 0xf67   :  { %v1225_v16 = vpop.xlane.xlu0 %1224 }
 0xf68   :  { %v1229_v17 = vmul.f32 0.03125, %v1225_v16 }
 0xf69   :  { %v1228_v15 = vpop.xlane.xlu1 %1227 }
 0xf6a   :  { %v1231_v52 = vsub.f32 %v1219_v11, %v1229_v17  ;;  %v1230_v56 = vmul.f32 0.03125, %v1228_v15 }
 0xf6c   :  { %v1232_v57 = vsub.f32 %v1220_v13, %v1230_v56  ;;  %v1233_v7 = vmul.f32 %v1231_v52, %v1231_v52 }
 0xf6e   :  { %v1235_v8 = vsel %vm32_vm1, %v1233_v7, 0.0  ;;  %v1234_v19 = vmul.f32 %v1232_v57, %v1232_v57 }
 0xf6f   :  { %1236 = vadd.xlane.f32.xlu0 %v1235_v8  ;;  %v1489_v8 = vld [vmem:[%s2256_s3 + $0xc8] sm:$0xff] }
 0xf70   :  { %v1238_v20 = vsel %vm32_vm1, %v1234_v19, 0.0  ;;  %v1490_v19 = vpack.c.bf16 %v1489_v8, %v1489_v8 }
 0xf71   :  { %1239 = vadd.xlane.f32.xlu1 %v1238_v20 }
 0xf72   :  { %v1495_v20 = vsel %vm209_vm3, %v1490_v19, 0 }
 0xffc   :  { %v1237_v27 = vpop.xlane.xlu0 %1236 }
 0xffd   :  { %v1241_v18 = vmul.f32 0.03125, %v1237_v27 }
 0xffe   :  { %v1240_v28 = vpop.xlane.xlu1 %1239 }
 0xfff   :  { %v1243_v29 = vadd.f32 1e-05, %v1241_v18  ;;  %v1242_v30 = vmul.f32 0.03125, %v1240_v28 }
0x1001   :  { %1870 = vrsqrt.f32 %v1243_v29  ;;  %v1244_v31 = vadd.f32 1e-05, %v1242_v30 }
0x1003   :  { %1872 = vrsqrt.f32 %v1244_v31 }
0x100b   :  { %v1871_v32 = vpop.eup %1870 }
0x100c   :  { %v1247_v34 = vmul.f32 %v1871_v32, %v1231_v52 }
0x100d   :  { %v1873_v35 = vpop.eup %1872 }
0x100e   :  { %v1253_v37 = vmul.f32 %v1571_v33, %v1247_v34  ;;  %v1248_v38 = vmul.f32 %v1873_v35, %v1232_v57 }
0x1010   :  { %v1254_v40 = vmul.f32 %v1571_v33, %v1248_v38  ;;  %v1259_v42 = vadd.f32 %v1572_v39, %v1253_v37 }
0x1012   :  { %v1260_v43 = vadd.f32 %v1572_v39, %v1254_v40 }
0x1014   :  { %v1266_v44 = vpack.c.bf16 %v1260_v43, %v1259_v42 }
0x1016   :  { %1772 = vmatmul.mubr.msk.bf16.vlgmr.msra.gmra.mrb[40].mxu0 %vm32_vm1, %v1266_v44 }
0x1017   :  { %1776 = vmatpush3.bf16.msra.mxu0 %v1321_v45  ;;  %1777 = vmatprep.mubr.msk.bf16.mxu0 %vm1883_vm0, %v1882_v0 }
0x1018   :  { %1787 = vmatprep.subr.bf16.mxu0 %v1882_v0 }
0x1022   :  { %1778 = vmatmul.mubr.msk.bf16.vlgmr.msra.gmra.mrb[40].mxu0 %vm82_vm2, %v1263_v48 }
0x1023   :  { %1789 = vmatprep.mubr.msk.bf16.mxu0 %vm1883_vm0, %v1882_v0 }
0x10f5   :  { %v1357_v49 = vpop.f32.mrb[40].mxu0 }
0x10f6   :  { %v1364_v50 = vpack.c.bf16 %v1357_v49, %v1357_v49  ;;  %v1779_v51 = vpop.f32.mrb[41].mxu0 }
0x10f7   :  { %v1360_v53 = vpop.f32.mrb[42].mxu0 }
0x10f8   :  { %v1365_v54 = vpack.c.bf16 %v1360_v53, %v1360_v53  ;;  %1367 = vrot.lane.b32.xlu0 %v1364_v50, %s1890_s8  ;;  %v1780_v55 = vpop.f32.mrb[43].mxu0 }
0x10fa   :  { %1416 = vrot.lane.b32.xlu1 %v1365_v54, %s1890_s8 }
0x116a   :  { %v1368_v58 = vpop.permute.xlu0 %1367 }
0x116b   :  { %v1373_v59 = vsel %vm993_vm4, %v1368_v58, 0 }
0x116c   :  { %1782 = vmatpush3.bf16.xpose.msra.mxu1 %v1373_v59  ;;  %v1417_v60 = vpop.permute.xlu1 %1416 }
0x116d   :  { %v1422_v61 = vsel %vm993_vm4, %v1417_v60, 0  ;;  %1793 = vmatprep.subr.bf16.mxu1 %v1882_v0 }
0x116e   :  { %1788 = vmatpush3.bf16.xpose.msra.mxu0 %v1422_v61 }
0x1173   :  { %1784 = vmatmul.mubr.msk.bf16.vlgmr.msra.gmra.mrb[40].mxu1 %vm993_vm4, %v1364_v50 }
0x1174   :  { %1795 = vmatprep.mubr.msk.bf16.mxu1 %vm1883_vm0, %v1882_v0  ;;  %1794 = vmatpush3.bf16.msra.mxu1 %v1495_v20 }
0x1175   :  { %1790 = vmatmul.mubr.msk.bf16.vlgmr.msra.gmra.mrb[44].mxu0 %vm993_vm4, %v1365_v54 }
0x1246   :  { %v1409_v4 = vpop.f32.mrb[40].mxu1 }
0x1247   :  { %v1464_v62 = vmul.f32 0.25, %v1409_v4  ;;  %v1785_v63 = vpop.f32.mrb[41].mxu1 }
0x1248   :  { %v1412_v1 = vpop.f32.mrb[42].mxu1  ;;  %v1458_v2 = vpop.f32.mrb[44].mxu0 }
0x1249   :  { %v1465_v3 = vmul.f32 0.25, %v1458_v2  ;;  %v1786_v5 = vpop.f32.mrb[43].mxu1  ;;  %v1791_v6 = vpop.f32.mrb[45].mxu0  ;;  %v1466_v9 = vsel %vm82_vm2, %v1464_v62, -inf }
0x124a   :  { %1467 = vmax.xlane.f32.xlu1 %v1466_v9  ;;  %v1461_v10 = vpop.f32.mrb[46].mxu0 }
0x124b   :  { %v1792_v11 = vpop.f32.mrb[47].mxu0  ;;  %v1469_v12 = vsel %vm82_vm2, %v1465_v3, -inf }
0x124c   :  { %1470 = vmax.xlane.f32.xlu0 %v1469_v12 }
0x12d7   :  { %v1468_v13 = vpop.xlane.xlu1 %1467 }
0x12d8   :  { %v1472_v0 = vsub.f32 %v1464_v62, %v1468_v13 }
0x12d9   :  { %v1471_v14 = vpop.xlane.xlu0 %1470 }
0x12da   :  { %v1474_v16 = vmul.f32 1.442695, %v1472_v0  ;;  %v1473_v17 = vsub.f32 %v1465_v3, %v1471_v14 }
0x12dc   :  { %1874 = vpow2.f32 %v1474_v16  ;;  %v1476_v15 = vmul.f32 1.442695, %v1473_v17 }
0x12de   :  { %1876 = vpow2.f32 %v1476_v15 }
0x12e6   :  { %v1875_v52 = vpop.eup %1874 }
0x12e7   :  { %v1478_v56 = vsel %vm82_vm2, %v1875_v52, 0.0 }
0x12e8   :  { %v1877_v57 = vpop.eup %1876  ;;  %1479 = vadd.xlane.f32.xlu0 %v1478_v56 }
0x12e9   :  { %v1481_v7 = vsel %vm82_vm2, %v1877_v57, 0.0 }
0x12ea   :  { %1482 = vadd.xlane.f32.xlu1 %v1481_v7 }
0x1375   :  { %v1480_v21 = vpop.xlane.xlu0 %1479 }
0x1376   :  { %1878 = vrcp.f32 %v1480_v21 }
0x1377   :  { %v1483_v22 = vpop.xlane.xlu1 %1482 }
0x1378   :  { %1880 = vrcp.f32 %v1483_v22 }
0x1380   :  { %v1879_v23 = vpop.eup %1878 }
0x1381   :  { %v1486_v25 = vmul.f32 %v1879_v23, %v1875_v52 }
0x1382   :  { %v1881_v24 = vpop.eup %1880 }
0x1383   :  { %v1487_v26 = vmul.f32 %v1881_v24, %v1877_v57 }
0x1385   :  { %v1488_v27 = vpack.c.bf16 %v1487_v26, %v1486_v25 }
0x1387   :  { %1796 = vmatmul.mubr.msk.bf16.vlgmr.msra.gmra.mrb[44].mxu1 %vm82_vm2, %v1488_v27 }
0x145a   :  { %v1531_v18 = vpop.f32.mrb[44].mxu1 }
0x145b   :  { %1539 = vst.msk [vmem:[%s2260_s4] sm:$0xff] %vm1538_vm7, %v1531_v18  ;;  %v1797_v28 = vpop.f32.mrb[45].mxu1 }
0x145c   :  { %v1534_v29 = vpop.f32.mrb[46].mxu1 }
0x145d   :  { %1540 = vst.msk [vmem:[%s2260_s4 + $0x8] sm:$0xff] %vm1538_vm7, %v1534_v29  ;;  %v1798_v30 = vpop.f32.mrb[47].mxu1 }

</bundles_post_ra>
